<compile_context>
chip_gen: v7x
topology: tpu7x:2x2x1
jax: 0.10.0
libtpu: 0.0.40
codegen_flags: <defaults>
</compile_context>

<pallas_src>
import functools
import math

import jax
import jax.numpy as jnp
import numpy as np
from jax.experimental import pallas as pl
from jax.experimental.pallas import tpu as pltpu


PAD = 4  # spatial zero halo per side (>=3 needed for 7x7 taps; 4 keeps
         # W+2*PAD a multiple of 8 so H*(W+2*PAD) is lane-dense for H=W=16)


# ----------------------------- Pallas kernel ------------------------------- #

def _msdc_kernel(x_ref, w_ref, b_ref, wc_ref, bc_ref, o_ref, s_ref, *,
                 H, Wp, cin_pad, slope):
    """Fused MSDC forward for one block of `nb` images.

    x_ref : (nb, cin_pad, Hp*Wp) bf16   zero-halo padded, flattened NCHW input
    w_ref : (3*mid, 49*cin_pad) bf16    merged 3x3/5x5/7x7 weights (7x7 taps)
    b_ref : (3*mid, 1) f32              merged branch biases
    wc_ref: (mid, 3*mid) bf16           1x1 "cat" conv weights
    bc_ref: (mid, 1) f32                1x1 conv bias
    o_ref : (nb, mid, H*Wp) f32         flattened output (padded row stride)
    s_ref : (49*cin_pad, nb*H*Wp) bf16  im2col operand scratch (streamed taps)
    """
    nb = x_ref.shape[0]
    L = H * Wp                 # lanes per image (multiple of 128 in the demo)
    base = PAD * Wp            # flat offset of padded row PAD, column 0

    # ---- build the shared im2col operand: one aligned 8-row store per tap ----
    # Each (dy, dx) tap is a contiguous lane slice of the zero-padded flat
    # input; no masks, no in-kernel zero fills, live set stays ~1 vreg.
    t = 0
    for dy in range(-3, 4):
        for dx in range(-3, 4):
            d = dy * Wp + dx
            for n in range(nb):
                s_ref[t * cin_pad:(t + 1) * cin_pad, n * L:(n + 1) * L] = (
                    x_ref[n, :, base + d:base + d + L])
            t += 1

    # ---- all three conv branches as ONE MXU matmul + bias + LeakyReLU ----
    acc = jnp.dot(w_ref[...], s_ref[...], preferred_element_type=jnp.float32)
    acc = acc + b_ref[...]
    cat = jnp.where(acc > 0, acc, slope * acc).astype(jnp.bfloat16)  # (3*mid, nb*L)

    # ---- 1x1 "cat" conv + LeakyReLU ----
    out = jnp.dot(wc_ref[...], cat, preferred_element_type=jnp.float32)
    out = out + bc_ref[...]
    out = jnp.where(out > 0, out, slope * out)

    for n in range(nb):
        o_ref[n] = out[:, n * L:(n + 1) * L].astype(o_ref.dtype)


# ------------------------------ JAX wrapper --------------------------------- #

def _embed_to_7x7(w, cin_pad):
    """OIHW (mid, Cin, k, k) -> (mid, 49*cin_pad).

    Zero-embed the kxk kernel into the 7x7 tap grid (and Cin into cin_pad),
    then flatten tap-major / channel-minor to match the kernel's im2col rows.
    """
    cout, cin, k, _ = w.shape
    r = k // 2
    w_full = jnp.zeros((cout, cin_pad, 7, 7), w.dtype)
    w_full = w_full.at[:, :cin, 3 - r:3 + r + 1, 3 - r:3 + r + 1].set(w)
    return jnp.transpose(w_full, (0, 2, 3, 1)).reshape(cout, 49 * cin_pad)


def msdc_forward(x_nchw, params, *, negative_slope=0.2, images_per_step=None):
    """MSDC forward. x_nchw: (N, Cin, H, W) f32 -> (N, mid, H, W) f32."""
    w1, b1, w3, b3, w5, b5, wc, bc = params
    N, Cin, H, W = x_nchw.shape
    mid = w1.shape[0]
    cin_pad = ((Cin + 7) // 8) * 8            # sublane-aligned channel groups
    Hp, Wp = H + 2 * PAD, W + 2 * PAD
    L = H * Wp                                # output lanes per image

    if images_per_step is None:
        # Amortize the ~0.35us/step pipeline overhead for large N, but keep
        # >= 2 grid steps so both v7x TensorCores get work.
        images_per_step = 1 if N <= 2 else min(4, N // 2)
        while N % images_per_step:
            images_per_step -= 1
    nb = images_per_step
    assert N % nb == 0

    # Merged branch weights: one (3*mid, 49*cin_pad) bf16 matmul operand.
    w_merged = jnp.concatenate(
        [_embed_to_7x7(w1, cin_pad), _embed_to_7x7(w3, cin_pad),
         _embed_to_7x7(w5, cin_pad)], axis=0).astype(jnp.bfloat16)
    b_merged = jnp.concatenate([b1, b3, b5]).reshape(3 * mid, 1).astype(jnp.float32)
    wc_f = wc.reshape(mid, 3 * mid).astype(jnp.bfloat16)
    bc_f = bc.reshape(mid, 1).astype(jnp.float32)

    # Zero-halo pad (channel + spatial) once in the wrapper; with row stride
    # Wp every 7x7 tap becomes a contiguous, mask-free lane slice in-kernel.
    x_pad = jnp.pad(x_nchw, ((0, 0), (0, cin_pad - Cin), (PAD, PAD), (PAD, PAD)))
    x_flat = x_pad.reshape(N, cin_pad, Hp * Wp).astype(jnp.bfloat16)

    kernel = functools.partial(_msdc_kernel, H=H, Wp=Wp, cin_pad=cin_pad,
                               slope=negative_slope)
    const = lambda n: (0, 0)

    out_flat = pl.pallas_call(
        kernel,
        grid=(N // nb,),
        in_specs=[
            pl.BlockSpec((nb, cin_pad, Hp * Wp), lambda n: (n, 0, 0)),
            pl.BlockSpec(w_merged.shape, const),
            pl.BlockSpec(b_merged.shape, const),
            pl.BlockSpec(wc_f.shape, const),
            pl.BlockSpec(bc_f.shape, const),
        ],
        out_specs=pl.BlockSpec((nb, mid, L), lambda n: (n, 0, 0)),
        out_shape=jax.ShapeDtypeStruct((N, mid, L), jnp.float32),
        scratch_shapes=[pltpu.VMEM((49 * cin_pad, nb * L), jnp.bfloat16)],
        compiler_params=pltpu.CompilerParams(
            dimension_semantics=("parallel",)),
    )(x_flat, w_merged, b_merged, wc_f, bc_f)

    # Drop the width-halo columns (output rows carry the padded row stride Wp).
    return out_flat.reshape(N, mid, H, Wp)[..., PAD:PAD + W]


# --------------------------- parameter construction ------------------------- #

def init_msdc_params(key, in_ch, mid_ch):
    """PyTorch-Conv2d-style init (uniform +-1/sqrt(fan_in)), OIHW layout."""
    def conv_init(k, cout, cin, ksize):
        k1, k2 = jax.random.split(k)
        bound = 1.0 / math.sqrt(cin * ksize * ksize)
        w = jax.random.uniform(k1, (cout, cin, ksize, ksize), jnp.float32,
                               -bound, bound)
        b = jax.random.uniform(k2, (cout,), jnp.float32, -bound, bound)
        return w, b

    k1, k2, k3, k4 = jax.random.split(key, 4)
    w1, b1 = conv_init(k1, mid_ch, in_ch, 3)
    w3, b3 = conv_init(k2, mid_ch, in_ch, 5)
    w5, b5 = conv_init(k3, mid_ch, in_ch, 7)
    wc, bc = conv_init(k4, mid_ch, 3 * mid_ch, 1)
    return (w1, b1, w3, b3, w5, b5, wc, bc)


# ------------------------------ pure-JAX reference -------------------------- #

def _ref_conv(x, w, b, p):
    y = jax.lax.conv_general_dilated(
        x, w, window_strides=(1, 1), padding=[(p, p), (p, p)],
        dimension_numbers=("NCHW", "OIHW", "NCHW"))
    return y + b.reshape(1, -1, 1, 1)


def _lrelu(v, slope=0.2):
    return jnp.where(v > 0, v, slope * v)


def msdc_reference(x, params):
    w1, b1, w3, b3, w5, b5, wc, bc = params
    c1 = _lrelu(_ref_conv(x, w1, b1, 1))
    c3 = _lrelu(_ref_conv(x, w3, b3, 2))
    c5 = _lrelu(_ref_conv(x, w5, b5, 3))
    cat = jnp.concatenate([c1, c3, c5], axis=1)
    return _lrelu(_ref_conv(cat, wc, bc, 0))


# ----------------------------------- main ----------------------------------- #

if __name__ == "__main__":
    key = jax.random.PRNGKey(0)
    key, kx, kp = jax.random.split(key, 3)

    # MSDC(in_channel=4, mid_channel=32, out_channel=32); out_channel is unused
    # by MSDC.forward (same as in the PyTorch module).
    in_ch, mid_ch = 4, 32
    N, H, W = 2, 16, 16

    x = jax.random.normal(kx, (N, in_ch, H, W), jnp.float32)
    params = init_msdc_params(kp, in_ch, mid_ch)

    fwd = jax.jit(msdc_forward)
    out = jax.block_until_ready(fwd(x, params))
    assert out.shape == (N, mid_ch, H, W), out.shape

    ref = jax.block_until_ready(msdc_reference(x, params))
    # bf16 matmul operands with f32 accumulation -> loose-ish tolerance.
    np.testing.assert_allclose(np.asarray(out), np.asarray(ref),
                               rtol=5e-2, atol=5e-2)

    print("KERNEL_OK")
</pallas_src>

<mosaic_0001>
module attributes {stable_mosaic.version = 11 : i64} {
  func.func @_msdc_kernel(%arg0: i32, %arg1: memref<1x8x576xbf16, #tpu.memory_space<vmem>>, %arg2: memref<96x392xbf16, #tpu.memory_space<vmem>>, %arg3: memref<96x1xf32, #tpu.memory_space<vmem>>, %arg4: memref<32x96xbf16, #tpu.memory_space<vmem>>, %arg5: memref<32x1xf32, #tpu.memory_space<vmem>>, %arg6: memref<1x32x384xf32, #tpu.memory_space<vmem>>, %arg7: memref<392x384xbf16, #tpu.memory_space<vmem>>) attributes {dimension_semantics = [#tpu.dimension_semantics<parallel>], iteration_bounds = array<i64: 2>, scalar_prefetch = 0 : i64, scratch_operands = 1 : i64, tpu.core_type = #tpu.core_type<tc>, window_params = [{transform_indices = @transform_0, window_bounds = array<i64: 1, 8, 576>}, {pipeline_mode = #tpu.pipeline_mode<synchronous>, transform_indices = @transform_1, window_bounds = array<i64: 96, 392>}, {pipeline_mode = #tpu.pipeline_mode<synchronous>, transform_indices = @transform_2, window_bounds = array<i64: 96, 1>}, {pipeline_mode = #tpu.pipeline_mode<synchronous>, transform_indices = @transform_3, window_bounds = array<i64: 32, 96>}, {pipeline_mode = #tpu.pipeline_mode<synchronous>, transform_indices = @transform_4, window_bounds = array<i64: 32, 1>}, {transform_indices = @transform_5, window_bounds = array<i64: 1, 32, 384>}]} {
    %c0 = arith.constant 0 : index
    %c0_0 = arith.constant 0 : index
    %c21 = arith.constant 21 : index
    %0 = vector.load %arg1[%c0, %c0_0, %c21] : memref<1x8x576xbf16, #tpu.memory_space<vmem>>, vector<1x8x384xbf16>
    %1 = vector.shape_cast %0 : vector<1x8x384xbf16> to vector<8x384xbf16>
    %c0_1 = arith.constant 0 : index
    %c0_2 = arith.constant 0 : index
    %2 = vector.load %arg7[%c0_1, %c0_2] : memref<392x384xbf16, #tpu.memory_space<vmem>>, vector<8x384xbf16>
    tpu.vector_store %arg7[%c0_1, %c0_2], %1 {strides = array<i32>} : memref<392x384xbf16, #tpu.memory_space<vmem>>, vector<8x384xbf16>,
    %c0_3 = arith.constant 0 : index
    %c0_4 = arith.constant 0 : index
    %c22 = arith.constant 22 : index
    %3 = vector.load %arg1[%c0_3, %c0_4, %c22] : memref<1x8x576xbf16, #tpu.memory_space<vmem>>, vector<1x8x384xbf16>
    %4 = vector.shape_cast %3 : vector<1x8x384xbf16> to vector<8x384xbf16>
    %c8 = arith.constant 8 : index
    %c0_5 = arith.constant 0 : index
    %5 = vector.load %arg7[%c8, %c0_5] : memref<392x384xbf16, #tpu.memory_space<vmem>>, vector<8x384xbf16>
    tpu.vector_store %arg7[%c8, %c0_5], %4 {strides = array<i32>} : memref<392x384xbf16, #tpu.memory_space<vmem>>, vector<8x384xbf16>,
    %c0_6 = arith.constant 0 : index
    %c0_7 = arith.constant 0 : index
    %c23 = arith.constant 23 : index
    %6 = vector.load %arg1[%c0_6, %c0_7, %c23] : memref<1x8x576xbf16, #tpu.memory_space<vmem>>, vector<1x8x384xbf16>
    %7 = vector.shape_cast %6 : vector<1x8x384xbf16> to vector<8x384xbf16>
    %c16 = arith.constant 16 : index
    %c0_8 = arith.constant 0 : index
    %8 = vector.load %arg7[%c16, %c0_8] : memref<392x384xbf16, #tpu.memory_space<vmem>>, vector<8x384xbf16>
    tpu.vector_store %arg7[%c16, %c0_8], %7 {strides = array<i32>} : memref<392x384xbf16, #tpu.memory_space<vmem>>, vector<8x384xbf16>,
    %c0_9 = arith.constant 0 : index
    %c0_10 = arith.constant 0 : index
    %c24 = arith.constant 24 : index
    %9 = vector.load %arg1[%c0_9, %c0_10, %c24] : memref<1x8x576xbf16, #tpu.memory_space<vmem>>, vector<1x8x384xbf16>
    %10 = vector.shape_cast %9 : vector<1x8x384xbf16> to vector<8x384xbf16>
    %c24_11 = arith.constant 24 : index
    %c0_12 = arith.constant 0 : index
    %11 = vector.load %arg7[%c24_11, %c0_12] : memref<392x384xbf16, #tpu.memory_space<vmem>>, vector<8x384xbf16>
    tpu.vector_store %arg7[%c24_11, %c0_12], %10 {strides = array<i32>} : memref<392x384xbf16, #tpu.memory_space<vmem>>, vector<8x384xbf16>,
    %c0_13 = arith.constant 0 : index
    %c0_14 = arith.constant 0 : index
    %c25 = arith.constant 25 : index
    %12 = vector.load %arg1[%c0_13, %c0_14, %c25] : memref<1x8x576xbf16, #tpu.memory_space<vmem>>, vector<1x8x384xbf16>
    %13 = vector.shape_cast %12 : vector<1x8x384xbf16> to vector<8x384xbf16>
    %c32 = arith.constant 32 : index
    %c0_15 = arith.constant 0 : index
    %14 = vector.load %arg7[%c32, %c0_15] : memref<392x384xbf16, #tpu.memory_space<vmem>>, vector<8x384xbf16>
    tpu.vector_store %arg7[%c32, %c0_15], %13 {strides = array<i32>} : memref<392x384xbf16, #tpu.memory_space<vmem>>, vector<8x384xbf16>,
    %c0_16 = arith.constant 0 : index
    %c0_17 = arith.constant 0 : index
    %c26 = arith.constant 26 : index
    %15 = vector.load %arg1[%c0_16, %c0_17, %c26] : memref<1x8x576xbf16, #tpu.memory_space<vmem>>, vector<1x8x384xbf16>
    %16 = vector.shape_cast %15 : vector<1x8x384xbf16> to vector<8x384xbf16>
    %c40 = arith.constant 40 : index
    %c0_18 = arith.constant 0 : index
    %17 = vector.load %arg7[%c40, %c0_18] : memref<392x384xbf16, #tpu.memory_space<vmem>>, vector<8x384xbf16>
    tpu.vector_store %arg7[%c40, %c0_18], %16 {strides = array<i32>} : memref<392x384xbf16, #tpu.memory_space<vmem>>, vector<8x384xbf16>,
    %c0_19 = arith.constant 0 : index
    %c0_20 = arith.constant 0 : index
    %c27 = arith.constant 27 : index
    %18 = vector.load %arg1[%c0_19, %c0_20, %c27] : memref<1x8x576xbf16, #tpu.memory_space<vmem>>, vector<1x8x384xbf16>
    %19 = vector.shape_cast %18 : vector<1x8x384xbf16> to vector<8x384xbf16>
    %c48 = arith.constant 48 : index
    %c0_21 = arith.constant 0 : index
    %20 = vector.load %arg7[%c48, %c0_21] : memref<392x384xbf16, #tpu.memory_space<vmem>>, vector<8x384xbf16>
    tpu.vector_store %arg7[%c48, %c0_21], %19 {strides = array<i32>} : memref<392x384xbf16, #tpu.memory_space<vmem>>, vector<8x384xbf16>,
    %c0_22 = arith.constant 0 : index
    %c0_23 = arith.constant 0 : index
    %c45 = arith.constant 45 : index
    %21 = vector.load %arg1[%c0_22, %c0_23, %c45] : memref<1x8x576xbf16, #tpu.memory_space<vmem>>, vector<1x8x384xbf16>
    %22 = vector.shape_cast %21 : vector<1x8x384xbf16> to vector<8x384xbf16>
    %c56 = arith.constant 56 : index
    %c0_24 = arith.constant 0 : index
    %23 = vector.load %arg7[%c56, %c0_24] : memref<392x384xbf16, #tpu.memory_space<vmem>>, vector<8x384xbf16>
    tpu.vector_store %arg7[%c56, %c0_24], %22 {strides = array<i32>} : memref<392x384xbf16, #tpu.memory_space<vmem>>, vector<8x384xbf16>,
    %c0_25 = arith.constant 0 : index
    %c0_26 = arith.constant 0 : index
    %c46 = arith.constant 46 : index
    %24 = vector.load %arg1[%c0_25, %c0_26, %c46] : memref<1x8x576xbf16, #tpu.memory_space<vmem>>, vector<1x8x384xbf16>
    %25 = vector.shape_cast %24 : vector<1x8x384xbf16> to vector<8x384xbf16>
    %c64 = arith.constant 64 : index
    %c0_27 = arith.constant 0 : index
    %26 = vector.load %arg7[%c64, %c0_27] : memref<392x384xbf16, #tpu.memory_space<vmem>>, vector<8x384xbf16>
    tpu.vector_store %arg7[%c64, %c0_27], %25 {strides = array<i32>} : memref<392x384xbf16, #tpu.memory_space<vmem>>, vector<8x384xbf16>,
    %c0_28 = arith.constant 0 : index
    %c0_29 = arith.constant 0 : index
    %c47 = arith.constant 47 : index
    %27 = vector.load %arg1[%c0_28, %c0_29, %c47] : memref<1x8x576xbf16, #tpu.memory_space<vmem>>, vector<1x8x384xbf16>
    %28 = vector.shape_cast %27 : vector<1x8x384xbf16> to vector<8x384xbf16>
    %c72 = arith.constant 72 : index
    %c0_30 = arith.constant 0 : index
    %29 = vector.load %arg7[%c72, %c0_30] : memref<392x384xbf16, #tpu.memory_space<vmem>>, vector<8x384xbf16>
    tpu.vector_store %arg7[%c72, %c0_30], %28 {strides = array<i32>} : memref<392x384xbf16, #tpu.memory_space<vmem>>, vector<8x384xbf16>,
    %c0_31 = arith.constant 0 : index
    %c0_32 = arith.constant 0 : index
    %c48_33 = arith.constant 48 : index
    %30 = vector.load %arg1[%c0_31, %c0_32, %c48_33] : memref<1x8x576xbf16, #tpu.memory_space<vmem>>, vector<1x8x384xbf16>
    %31 = vector.shape_cast %30 : vector<1x8x384xbf16> to vector<8x384xbf16>
    %c80 = arith.constant 80 : index
    %c0_34 = arith.constant 0 : index
    %32 = vector.load %arg7[%c80, %c0_34] : memref<392x384xbf16, #tpu.memory_space<vmem>>, vector<8x384xbf16>
    tpu.vector_store %arg7[%c80, %c0_34], %31 {strides = array<i32>} : memref<392x384xbf16, #tpu.memory_space<vmem>>, vector<8x384xbf16>,
    %c0_35 = arith.constant 0 : index
    %c0_36 = arith.constant 0 : index
    %c49 = arith.constant 49 : index
    %33 = vector.load %arg1[%c0_35, %c0_36, %c49] : memref<1x8x576xbf16, #tpu.memory_space<vmem>>, vector<1x8x384xbf16>
    %34 = vector.shape_cast %33 : vector<1x8x384xbf16> to vector<8x384xbf16>
    %c88 = arith.constant 88 : index
    %c0_37 = arith.constant 0 : index
    %35 = vector.load %arg7[%c88, %c0_37] : memref<392x384xbf16, #tpu.memory_space<vmem>>, vector<8x384xbf16>
    tpu.vector_store %arg7[%c88, %c0_37], %34 {strides = array<i32>} : memref<392x384xbf16, #tpu.memory_space<vmem>>, vector<8x384xbf16>,
    %c0_38 = arith.constant 0 : index
    %c0_39 = arith.constant 0 : index
    %c50 = arith.constant 50 : index
    %36 = vector.load %arg1[%c0_38, %c0_39, %c50] : memref<1x8x576xbf16, #tpu.memory_space<vmem>>, vector<1x8x384xbf16>
    %37 = vector.shape_cast %36 : vector<1x8x384xbf16> to vector<8x384xbf16>
    %c96 = arith.constant 96 : index
    %c0_40 = arith.constant 0 : index
    %38 = vector.load %arg7[%c96, %c0_40] : memref<392x384xbf16, #tpu.memory_space<vmem>>, vector<8x384xbf16>
    tpu.vector_store %arg7[%c96, %c0_40], %37 {strides = array<i32>} : memref<392x384xbf16, #tpu.memory_space<vmem>>, vector<8x384xbf16>,
    %c0_41 = arith.constant 0 : index
    %c0_42 = arith.constant 0 : index
    %c51 = arith.constant 51 : index
    %39 = vector.load %arg1[%c0_41, %c0_42, %c51] : memref<1x8x576xbf16, #tpu.memory_space<vmem>>, vector<1x8x384xbf16>
    %40 = vector.shape_cast %39 : vector<1x8x384xbf16> to vector<8x384xbf16>
    %c104 = arith.constant 104 : index
    %c0_43 = arith.constant 0 : index
    %41 = vector.load %arg7[%c104, %c0_43] : memref<392x384xbf16, #tpu.memory_space<vmem>>, vector<8x384xbf16>
    tpu.vector_store %arg7[%c104, %c0_43], %40 {strides = array<i32>} : memref<392x384xbf16, #tpu.memory_space<vmem>>, vector<8x384xbf16>,
    %c0_44 = arith.constant 0 : index
    %c0_45 = arith.constant 0 : index
    %c69 = arith.constant 69 : index
    %42 = vector.load %arg1[%c0_44, %c0_45, %c69] : memref<1x8x576xbf16, #tpu.memory_space<vmem>>, vector<1x8x384xbf16>
    %43 = vector.shape_cast %42 : vector<1x8x384xbf16> to vector<8x384xbf16>
    %c112 = arith.constant 112 : index
    %c0_46 = arith.constant 0 : index
    %44 = vector.load %arg7[%c112, %c0_46] : memref<392x384xbf16, #tpu.memory_space<vmem>>, vector<8x384xbf16>
    tpu.vector_store %arg7[%c112, %c0_46], %43 {strides = array<i32>} : memref<392x384xbf16, #tpu.memory_space<vmem>>, vector<8x384xbf16>,
    %c0_47 = arith.constant 0 : index
    %c0_48 = arith.constant 0 : index
    %c70 = arith.constant 70 : index
    %45 = vector.load %arg1[%c0_47, %c0_48, %c70] : memref<1x8x576xbf16, #tpu.memory_space<vmem>>, vector<1x8x384xbf16>
    %46 = vector.shape_cast %45 : vector<1x8x384xbf16> to vector<8x384xbf16>
    %c120 = arith.constant 120 : index
    %c0_49 = arith.constant 0 : index
    %47 = vector.load %arg7[%c120, %c0_49] : memref<392x384xbf16, #tpu.memory_space<vmem>>, vector<8x384xbf16>
    tpu.vector_store %arg7[%c120, %c0_49], %46 {strides = array<i32>} : memref<392x384xbf16, #tpu.memory_space<vmem>>, vector<8x384xbf16>,
    %c0_50 = arith.constant 0 : index
    %c0_51 = arith.constant 0 : index
    %c71 = arith.constant 71 : index
    %48 = vector.load %arg1[%c0_50, %c0_51, %c71] : memref<1x8x576xbf16, #tpu.memory_space<vmem>>, vector<1x8x384xbf16>
    %49 = vector.shape_cast %48 : vector<1x8x384xbf16> to vector<8x384xbf16>
    %c128 = arith.constant 128 : index
    %c0_52 = arith.constant 0 : index
    %50 = vector.load %arg7[%c128, %c0_52] : memref<392x384xbf16, #tpu.memory_space<vmem>>, vector<8x384xbf16>
    tpu.vector_store %arg7[%c128, %c0_52], %49 {strides = array<i32>} : memref<392x384xbf16, #tpu.memory_space<vmem>>, vector<8x384xbf16>,
    %c0_53 = arith.constant 0 : index
    %c0_54 = arith.constant 0 : index
    %c72_55 = arith.constant 72 : index
    %51 = vector.load %arg1[%c0_53, %c0_54, %c72_55] : memref<1x8x576xbf16, #tpu.memory_space<vmem>>, vector<1x8x384xbf16>
    %52 = vector.shape_cast %51 : vector<1x8x384xbf16> to vector<8x384xbf16>
    %c136 = arith.constant 136 : index
    %c0_56 = arith.constant 0 : index
    %53 = vector.load %arg7[%c136, %c0_56] : memref<392x384xbf16, #tpu.memory_space<vmem>>, vector<8x384xbf16>
    tpu.vector_store %arg7[%c136, %c0_56], %52 {strides = array<i32>} : memref<392x384xbf16, #tpu.memory_space<vmem>>, vector<8x384xbf16>,
    %c0_57 = arith.constant 0 : index
    %c0_58 = arith.constant 0 : index
    %c73 = arith.constant 73 : index
    %54 = vector.load %arg1[%c0_57, %c0_58, %c73] : memref<1x8x576xbf16, #tpu.memory_space<vmem>>, vector<1x8x384xbf16>
    %55 = vector.shape_cast %54 : vector<1x8x384xbf16> to vector<8x384xbf16>
    %c144 = arith.constant 144 : index
    %c0_59 = arith.constant 0 : index
    %56 = vector.load %arg7[%c144, %c0_59] : memref<392x384xbf16, #tpu.memory_space<vmem>>, vector<8x384xbf16>
    tpu.vector_store %arg7[%c144, %c0_59], %55 {strides = array<i32>} : memref<392x384xbf16, #tpu.memory_space<vmem>>, vector<8x384xbf16>,
    %c0_60 = arith.constant 0 : index
    %c0_61 = arith.constant 0 : index
    %c74 = arith.constant 74 : index
    %57 = vector.load %arg1[%c0_60, %c0_61, %c74] : memref<1x8x576xbf16, #tpu.memory_space<vmem>>, vector<1x8x384xbf16>
    %58 = vector.shape_cast %57 : vector<1x8x384xbf16> to vector<8x384xbf16>
    %c152 = arith.constant 152 : index
    %c0_62 = arith.constant 0 : index
    %59 = vector.load %arg7[%c152, %c0_62] : memref<392x384xbf16, #tpu.memory_space<vmem>>, vector<8x384xbf16>
    tpu.vector_store %arg7[%c152, %c0_62], %58 {strides = array<i32>} : memref<392x384xbf16, #tpu.memory_space<vmem>>, vector<8x384xbf16>,
    %c0_63 = arith.constant 0 : index
    %c0_64 = arith.constant 0 : index
    %c75 = arith.constant 75 : index
    %60 = vector.load %arg1[%c0_63, %c0_64, %c75] : memref<1x8x576xbf16, #tpu.memory_space<vmem>>, vector<1x8x384xbf16>
    %61 = vector.shape_cast %60 : vector<1x8x384xbf16> to vector<8x384xbf16>
    %c160 = arith.constant 160 : index
    %c0_65 = arith.constant 0 : index
    %62 = vector.load %arg7[%c160, %c0_65] : memref<392x384xbf16, #tpu.memory_space<vmem>>, vector<8x384xbf16>
    tpu.vector_store %arg7[%c160, %c0_65], %61 {strides = array<i32>} : memref<392x384xbf16, #tpu.memory_space<vmem>>, vector<8x384xbf16>,
    %c0_66 = arith.constant 0 : index
    %c0_67 = arith.constant 0 : index
    %c93 = arith.constant 93 : index
    %63 = vector.load %arg1[%c0_66, %c0_67, %c93] : memref<1x8x576xbf16, #tpu.memory_space<vmem>>, vector<1x8x384xbf16>
    %64 = vector.shape_cast %63 : vector<1x8x384xbf16> to vector<8x384xbf16>
    %c168 = arith.constant 168 : index
    %c0_68 = arith.constant 0 : index
    %65 = vector.load %arg7[%c168, %c0_68] : memref<392x384xbf16, #tpu.memory_space<vmem>>, vector<8x384xbf16>
    tpu.vector_store %arg7[%c168, %c0_68], %64 {strides = array<i32>} : memref<392x384xbf16, #tpu.memory_space<vmem>>, vector<8x384xbf16>,
    %c0_69 = arith.constant 0 : index
    %c0_70 = arith.constant 0 : index
    %c94 = arith.constant 94 : index
    %66 = vector.load %arg1[%c0_69, %c0_70, %c94] : memref<1x8x576xbf16, #tpu.memory_space<vmem>>, vector<1x8x384xbf16>
    %67 = vector.shape_cast %66 : vector<1x8x384xbf16> to vector<8x384xbf16>
    %c176 = arith.constant 176 : index
    %c0_71 = arith.constant 0 : index
    %68 = vector.load %arg7[%c176, %c0_71] : memref<392x384xbf16, #tpu.memory_space<vmem>>, vector<8x384xbf16>
    tpu.vector_store %arg7[%c176, %c0_71], %67 {strides = array<i32>} : memref<392x384xbf16, #tpu.memory_space<vmem>>, vector<8x384xbf16>,
    %c0_72 = arith.constant 0 : index
    %c0_73 = arith.constant 0 : index
    %c95 = arith.constant 95 : index
    %69 = vector.load %arg1[%c0_72, %c0_73, %c95] : memref<1x8x576xbf16, #tpu.memory_space<vmem>>, vector<1x8x384xbf16>
    %70 = vector.shape_cast %69 : vector<1x8x384xbf16> to vector<8x384xbf16>
    %c184 = arith.constant 184 : index
    %c0_74 = arith.constant 0 : index
    %71 = vector.load %arg7[%c184, %c0_74] : memref<392x384xbf16, #tpu.memory_space<vmem>>, vector<8x384xbf16>
    tpu.vector_store %arg7[%c184, %c0_74], %70 {strides = array<i32>} : memref<392x384xbf16, #tpu.memory_space<vmem>>, vector<8x384xbf16>,
    %c0_75 = arith.constant 0 : index
    %c0_76 = arith.constant 0 : index
    %c96_77 = arith.constant 96 : index
    %72 = vector.load %arg1[%c0_75, %c0_76, %c96_77] : memref<1x8x576xbf16, #tpu.memory_space<vmem>>, vector<1x8x384xbf16>
    %73 = vector.shape_cast %72 : vector<1x8x384xbf16> to vector<8x384xbf16>
    %c192 = arith.constant 192 : index
    %c0_78 = arith.constant 0 : index
    %74 = vector.load %arg7[%c192, %c0_78] : memref<392x384xbf16, #tpu.memory_space<vmem>>, vector<8x384xbf16>
    tpu.vector_store %arg7[%c192, %c0_78], %73 {strides = array<i32>} : memref<392x384xbf16, #tpu.memory_space<vmem>>, vector<8x384xbf16>,
    %c0_79 = arith.constant 0 : index
    %c0_80 = arith.constant 0 : index
    %c97 = arith.constant 97 : index
    %75 = vector.load %arg1[%c0_79, %c0_80, %c97] : memref<1x8x576xbf16, #tpu.memory_space<vmem>>, vector<1x8x384xbf16>
    %76 = vector.shape_cast %75 : vector<1x8x384xbf16> to vector<8x384xbf16>
    %c200 = arith.constant 200 : index
    %c0_81 = arith.constant 0 : index
    %77 = vector.load %arg7[%c200, %c0_81] : memref<392x384xbf16, #tpu.memory_space<vmem>>, vector<8x384xbf16>
    tpu.vector_store %arg7[%c200, %c0_81], %76 {strides = array<i32>} : memref<392x384xbf16, #tpu.memory_space<vmem>>, vector<8x384xbf16>,
    %c0_82 = arith.constant 0 : index
    %c0_83 = arith.constant 0 : index
    %c98 = arith.constant 98 : index
    %78 = vector.load %arg1[%c0_82, %c0_83, %c98] : memref<1x8x576xbf16, #tpu.memory_space<vmem>>, vector<1x8x384xbf16>
    %79 = vector.shape_cast %78 : vector<1x8x384xbf16> to vector<8x384xbf16>
    %c208 = arith.constant 208 : index
    %c0_84 = arith.constant 0 : index
    %80 = vector.load %arg7[%c208, %c0_84] : memref<392x384xbf16, #tpu.memory_space<vmem>>, vector<8x384xbf16>
    tpu.vector_store %arg7[%c208, %c0_84], %79 {strides = array<i32>} : memref<392x384xbf16, #tpu.memory_space<vmem>>, vector<8x384xbf16>,
    %c0_85 = arith.constant 0 : index
    %c0_86 = arith.constant 0 : index
    %c99 = arith.constant 99 : index
    %81 = vector.load %arg1[%c0_85, %c0_86, %c99] : memref<1x8x576xbf16, #tpu.memory_space<vmem>>, vector<1x8x384xbf16>
    %82 = vector.shape_cast %81 : vector<1x8x384xbf16> to vector<8x384xbf16>
    %c216 = arith.constant 216 : index
    %c0_87 = arith.constant 0 : index
    %83 = vector.load %arg7[%c216, %c0_87] : memref<392x384xbf16, #tpu.memory_space<vmem>>, vector<8x384xbf16>
    tpu.vector_store %arg7[%c216, %c0_87], %82 {strides = array<i32>} : memref<392x384xbf16, #tpu.memory_space<vmem>>, vector<8x384xbf16>,
    %c0_88 = arith.constant 0 : index
    %c0_89 = arith.constant 0 : index
    %c117 = arith.constant 117 : index
    %84 = vector.load %arg1[%c0_88, %c0_89, %c117] : memref<1x8x576xbf16, #tpu.memory_space<vmem>>, vector<1x8x384xbf16>
    %85 = vector.shape_cast %84 : vector<1x8x384xbf16> to vector<8x384xbf16>
    %c224 = arith.constant 224 : index
    %c0_90 = arith.constant 0 : index
    %86 = vector.load %arg7[%c224, %c0_90] : memref<392x384xbf16, #tpu.memory_space<vmem>>, vector<8x384xbf16>
    tpu.vector_store %arg7[%c224, %c0_90], %85 {strides = array<i32>} : memref<392x384xbf16, #tpu.memory_space<vmem>>, vector<8x384xbf16>,
    %c0_91 = arith.constant 0 : index
    %c0_92 = arith.constant 0 : index
    %c118 = arith.constant 118 : index
    %87 = vector.load %arg1[%c0_91, %c0_92, %c118] : memref<1x8x576xbf16, #tpu.memory_space<vmem>>, vector<1x8x384xbf16>
    %88 = vector.shape_cast %87 : vector<1x8x384xbf16> to vector<8x384xbf16>
    %c232 = arith.constant 232 : index
    %c0_93 = arith.constant 0 : index
    %89 = vector.load %arg7[%c232, %c0_93] : memref<392x384xbf16, #tpu.memory_space<vmem>>, vector<8x384xbf16>
    tpu.vector_store %arg7[%c232, %c0_93], %88 {strides = array<i32>} : memref<392x384xbf16, #tpu.memory_space<vmem>>, vector<8x384xbf16>,
    %c0_94 = arith.constant 0 : index
    %c0_95 = arith.constant 0 : index
    %c119 = arith.constant 119 : index
    %90 = vector.load %arg1[%c0_94, %c0_95, %c119] : memref<1x8x576xbf16, #tpu.memory_space<vmem>>, vector<1x8x384xbf16>
    %91 = vector.shape_cast %90 : vector<1x8x384xbf16> to vector<8x384xbf16>
    %c240 = arith.constant 240 : index
    %c0_96 = arith.constant 0 : index
    %92 = vector.load %arg7[%c240, %c0_96] : memref<392x384xbf16, #tpu.memory_space<vmem>>, vector<8x384xbf16>
    tpu.vector_store %arg7[%c240, %c0_96], %91 {strides = array<i32>} : memref<392x384xbf16, #tpu.memory_space<vmem>>, vector<8x384xbf16>,
    %c0_97 = arith.constant 0 : index
    %c0_98 = arith.constant 0 : index
    %c120_99 = arith.constant 120 : index
    %93 = vector.load %arg1[%c0_97, %c0_98, %c120_99] : memref<1x8x576xbf16, #tpu.memory_space<vmem>>, vector<1x8x384xbf16>
    %94 = vector.shape_cast %93 : vector<1x8x384xbf16> to vector<8x384xbf16>
    %c248 = arith.constant 248 : index
    %c0_100 = arith.constant 0 : index
    %95 = vector.load %arg7[%c248, %c0_100] : memref<392x384xbf16, #tpu.memory_space<vmem>>, vector<8x384xbf16>
    tpu.vector_store %arg7[%c248, %c0_100], %94 {strides = array<i32>} : memref<392x384xbf16, #tpu.memory_space<vmem>>, vector<8x384xbf16>,
    %c0_101 = arith.constant 0 : index
    %c0_102 = arith.constant 0 : index
    %c121 = arith.constant 121 : index
    %96 = vector.load %arg1[%c0_101, %c0_102, %c121] : memref<1x8x576xbf16, #tpu.memory_space<vmem>>, vector<1x8x384xbf16>
    %97 = vector.shape_cast %96 : vector<1x8x384xbf16> to vector<8x384xbf16>
    %c256 = arith.constant 256 : index
    %c0_103 = arith.constant 0 : index
    %98 = vector.load %arg7[%c256, %c0_103] : memref<392x384xbf16, #tpu.memory_space<vmem>>, vector<8x384xbf16>
    tpu.vector_store %arg7[%c256, %c0_103], %97 {strides = array<i32>} : memref<392x384xbf16, #tpu.memory_space<vmem>>, vector<8x384xbf16>,
    %c0_104 = arith.constant 0 : index
    %c0_105 = arith.constant 0 : index
    %c122 = arith.constant 122 : index
    %99 = vector.load %arg1[%c0_104, %c0_105, %c122] : memref<1x8x576xbf16, #tpu.memory_space<vmem>>, vector<1x8x384xbf16>
    %100 = vector.shape_cast %99 : vector<1x8x384xbf16> to vector<8x384xbf16>
    %c264 = arith.constant 264 : index
    %c0_106 = arith.constant 0 : index
    %101 = vector.load %arg7[%c264, %c0_106] : memref<392x384xbf16, #tpu.memory_space<vmem>>, vector<8x384xbf16>
    tpu.vector_store %arg7[%c264, %c0_106], %100 {strides = array<i32>} : memref<392x384xbf16, #tpu.memory_space<vmem>>, vector<8x384xbf16>,
    %c0_107 = arith.constant 0 : index
    %c0_108 = arith.constant 0 : index
    %c123 = arith.constant 123 : index
    %102 = vector.load %arg1[%c0_107, %c0_108, %c123] : memref<1x8x576xbf16, #tpu.memory_space<vmem>>, vector<1x8x384xbf16>
    %103 = vector.shape_cast %102 : vector<1x8x384xbf16> to vector<8x384xbf16>
    %c272 = arith.constant 272 : index
    %c0_109 = arith.constant 0 : index
    %104 = vector.load %arg7[%c272, %c0_109] : memref<392x384xbf16, #tpu.memory_space<vmem>>, vector<8x384xbf16>
    tpu.vector_store %arg7[%c272, %c0_109], %103 {strides = array<i32>} : memref<392x384xbf16, #tpu.memory_space<vmem>>, vector<8x384xbf16>,
    %c0_110 = arith.constant 0 : index
    %c0_111 = arith.constant 0 : index
    %c141 = arith.constant 141 : index
    %105 = vector.load %arg1[%c0_110, %c0_111, %c141] : memref<1x8x576xbf16, #tpu.memory_space<vmem>>, vector<1x8x384xbf16>
    %106 = vector.shape_cast %105 : vector<1x8x384xbf16> to vector<8x384xbf16>
    %c280 = arith.constant 280 : index
    %c0_112 = arith.constant 0 : index
    %107 = vector.load %arg7[%c280, %c0_112] : memref<392x384xbf16, #tpu.memory_space<vmem>>, vector<8x384xbf16>
    tpu.vector_store %arg7[%c280, %c0_112], %106 {strides = array<i32>} : memref<392x384xbf16, #tpu.memory_space<vmem>>, vector<8x384xbf16>,
    %c0_113 = arith.constant 0 : index
    %c0_114 = arith.constant 0 : index
    %c142 = arith.constant 142 : index
    %108 = vector.load %arg1[%c0_113, %c0_114, %c142] : memref<1x8x576xbf16, #tpu.memory_space<vmem>>, vector<1x8x384xbf16>
    %109 = vector.shape_cast %108 : vector<1x8x384xbf16> to vector<8x384xbf16>
    %c288 = arith.constant 288 : index
    %c0_115 = arith.constant 0 : index
    %110 = vector.load %arg7[%c288, %c0_115] : memref<392x384xbf16, #tpu.memory_space<vmem>>, vector<8x384xbf16>
    tpu.vector_store %arg7[%c288, %c0_115], %109 {strides = array<i32>} : memref<392x384xbf16, #tpu.memory_space<vmem>>, vector<8x384xbf16>,
    %c0_116 = arith.constant 0 : index
    %c0_117 = arith.constant 0 : index
    %c143 = arith.constant 143 : index
    %111 = vector.load %arg1[%c0_116, %c0_117, %c143] : memref<1x8x576xbf16, #tpu.memory_space<vmem>>, vector<1x8x384xbf16>
    %112 = vector.shape_cast %111 : vector<1x8x384xbf16> to vector<8x384xbf16>
    %c296 = arith.constant 296 : index
    %c0_118 = arith.constant 0 : index
    %113 = vector.load %arg7[%c296, %c0_118] : memref<392x384xbf16, #tpu.memory_space<vmem>>, vector<8x384xbf16>
    tpu.vector_store %arg7[%c296, %c0_118], %112 {strides = array<i32>} : memref<392x384xbf16, #tpu.memory_space<vmem>>, vector<8x384xbf16>,
    %c0_119 = arith.constant 0 : index
    %c0_120 = arith.constant 0 : index
    %c144_121 = arith.constant 144 : index
    %114 = vector.load %arg1[%c0_119, %c0_120, %c144_121] : memref<1x8x576xbf16, #tpu.memory_space<vmem>>, vector<1x8x384xbf16>
    %115 = vector.shape_cast %114 : vector<1x8x384xbf16> to vector<8x384xbf16>
    %c304 = arith.constant 304 : index
    %c0_122 = arith.constant 0 : index
    %116 = vector.load %arg7[%c304, %c0_122] : memref<392x384xbf16, #tpu.memory_space<vmem>>, vector<8x384xbf16>
    tpu.vector_store %arg7[%c304, %c0_122], %115 {strides = array<i32>} : memref<392x384xbf16, #tpu.memory_space<vmem>>, vector<8x384xbf16>,
    %c0_123 = arith.constant 0 : index
    %c0_124 = arith.constant 0 : index
    %c145 = arith.constant 145 : index
    %117 = vector.load %arg1[%c0_123, %c0_124, %c145] : memref<1x8x576xbf16, #tpu.memory_space<vmem>>, vector<1x8x384xbf16>
    %118 = vector.shape_cast %117 : vector<1x8x384xbf16> to vector<8x384xbf16>
    %c312 = arith.constant 312 : index
    %c0_125 = arith.constant 0 : index
    %119 = vector.load %arg7[%c312, %c0_125] : memref<392x384xbf16, #tpu.memory_space<vmem>>, vector<8x384xbf16>
    tpu.vector_store %arg7[%c312, %c0_125], %118 {strides = array<i32>} : memref<392x384xbf16, #tpu.memory_space<vmem>>, vector<8x384xbf16>,
    %c0_126 = arith.constant 0 : index
    %c0_127 = arith.constant 0 : index
    %c146 = arith.constant 146 : index
    %120 = vector.load %arg1[%c0_126, %c0_127, %c146] : memref<1x8x576xbf16, #tpu.memory_space<vmem>>, vector<1x8x384xbf16>
    %121 = vector.shape_cast %120 : vector<1x8x384xbf16> to vector<8x384xbf16>
    %c320 = arith.constant 320 : index
    %c0_128 = arith.constant 0 : index
    %122 = vector.load %arg7[%c320, %c0_128] : memref<392x384xbf16, #tpu.memory_space<vmem>>, vector<8x384xbf16>
    tpu.vector_store %arg7[%c320, %c0_128], %121 {strides = array<i32>} : memref<392x384xbf16, #tpu.memory_space<vmem>>, vector<8x384xbf16>,
    %c0_129 = arith.constant 0 : index
    %c0_130 = arith.constant 0 : index
    %c147 = arith.constant 147 : index
    %123 = vector.load %arg1[%c0_129, %c0_130, %c147] : memref<1x8x576xbf16, #tpu.memory_space<vmem>>, vector<1x8x384xbf16>
    %124 = vector.shape_cast %123 : vector<1x8x384xbf16> to vector<8x384xbf16>
    %c328 = arith.constant 328 : index
    %c0_131 = arith.constant 0 : index
    %125 = vector.load %arg7[%c328, %c0_131] : memref<392x384xbf16, #tpu.memory_space<vmem>>, vector<8x384xbf16>
    tpu.vector_store %arg7[%c328, %c0_131], %124 {strides = array<i32>} : memref<392x384xbf16, #tpu.memory_space<vmem>>, vector<8x384xbf16>,
    %c0_132 = arith.constant 0 : index
    %c0_133 = arith.constant 0 : index
    %c165 = arith.constant 165 : index
    %126 = vector.load %arg1[%c0_132, %c0_133, %c165] : memref<1x8x576xbf16, #tpu.memory_space<vmem>>, vector<1x8x384xbf16>
    %127 = vector.shape_cast %126 : vector<1x8x384xbf16> to vector<8x384xbf16>
    %c336 = arith.constant 336 : index
    %c0_134 = arith.constant 0 : index
    %128 = vector.load %arg7[%c336, %c0_134] : memref<392x384xbf16, #tpu.memory_space<vmem>>, vector<8x384xbf16>
    tpu.vector_store %arg7[%c336, %c0_134], %127 {strides = array<i32>} : memref<392x384xbf16, #tpu.memory_space<vmem>>, vector<8x384xbf16>,
    %c0_135 = arith.constant 0 : index
    %c0_136 = arith.constant 0 : index
    %c166 = arith.constant 166 : index
    %129 = vector.load %arg1[%c0_135, %c0_136, %c166] : memref<1x8x576xbf16, #tpu.memory_space<vmem>>, vector<1x8x384xbf16>
    %130 = vector.shape_cast %129 : vector<1x8x384xbf16> to vector<8x384xbf16>
    %c344 = arith.constant 344 : index
    %c0_137 = arith.constant 0 : index
    %131 = vector.load %arg7[%c344, %c0_137] : memref<392x384xbf16, #tpu.memory_space<vmem>>, vector<8x384xbf16>
    tpu.vector_store %arg7[%c344, %c0_137], %130 {strides = array<i32>} : memref<392x384xbf16, #tpu.memory_space<vmem>>, vector<8x384xbf16>,
    %c0_138 = arith.constant 0 : index
    %c0_139 = arith.constant 0 : index
    %c167 = arith.constant 167 : index
    %132 = vector.load %arg1[%c0_138, %c0_139, %c167] : memref<1x8x576xbf16, #tpu.memory_space<vmem>>, vector<1x8x384xbf16>
    %133 = vector.shape_cast %132 : vector<1x8x384xbf16> to vector<8x384xbf16>
    %c352 = arith.constant 352 : index
    %c0_140 = arith.constant 0 : index
    %134 = vector.load %arg7[%c352, %c0_140] : memref<392x384xbf16, #tpu.memory_space<vmem>>, vector<8x384xbf16>
    tpu.vector_store %arg7[%c352, %c0_140], %133 {strides = array<i32>} : memref<392x384xbf16, #tpu.memory_space<vmem>>, vector<8x384xbf16>,
    %c0_141 = arith.constant 0 : index
    %c0_142 = arith.constant 0 : index
    %c168_143 = arith.constant 168 : index
    %135 = vector.load %arg1[%c0_141, %c0_142, %c168_143] : memref<1x8x576xbf16, #tpu.memory_space<vmem>>, vector<1x8x384xbf16>
    %136 = vector.shape_cast %135 : vector<1x8x384xbf16> to vector<8x384xbf16>
    %c360 = arith.constant 360 : index
    %c0_144 = arith.constant 0 : index
    %137 = vector.load %arg7[%c360, %c0_144] : memref<392x384xbf16, #tpu.memory_space<vmem>>, vector<8x384xbf16>
    tpu.vector_store %arg7[%c360, %c0_144], %136 {strides = array<i32>} : memref<392x384xbf16, #tpu.memory_space<vmem>>, vector<8x384xbf16>,
    %c0_145 = arith.constant 0 : index
    %c0_146 = arith.constant 0 : index
    %c169 = arith.constant 169 : index
    %138 = vector.load %arg1[%c0_145, %c0_146, %c169] : memref<1x8x576xbf16, #tpu.memory_space<vmem>>, vector<1x8x384xbf16>
    %139 = vector.shape_cast %138 : vector<1x8x384xbf16> to vector<8x384xbf16>
    %c368 = arith.constant 368 : index
    %c0_147 = arith.constant 0 : index
    %140 = vector.load %arg7[%c368, %c0_147] : memref<392x384xbf16, #tpu.memory_space<vmem>>, vector<8x384xbf16>
    tpu.vector_store %arg7[%c368, %c0_147], %139 {strides = array<i32>} : memref<392x384xbf16, #tpu.memory_space<vmem>>, vector<8x384xbf16>,
    %c0_148 = arith.constant 0 : index
    %c0_149 = arith.constant 0 : index
    %c170 = arith.constant 170 : index
    %141 = vector.load %arg1[%c0_148, %c0_149, %c170] : memref<1x8x576xbf16, #tpu.memory_space<vmem>>, vector<1x8x384xbf16>
    %142 = vector.shape_cast %141 : vector<1x8x384xbf16> to vector<8x384xbf16>
    %c376 = arith.constant 376 : index
    %c0_150 = arith.constant 0 : index
    %143 = vector.load %arg7[%c376, %c0_150] : memref<392x384xbf16, #tpu.memory_space<vmem>>, vector<8x384xbf16>
    tpu.vector_store %arg7[%c376, %c0_150], %142 {strides = array<i32>} : memref<392x384xbf16, #tpu.memory_space<vmem>>, vector<8x384xbf16>,
    %c0_151 = arith.constant 0 : index
    %c0_152 = arith.constant 0 : index
    %c171 = arith.constant 171 : index
    %144 = vector.load %arg1[%c0_151, %c0_152, %c171] : memref<1x8x576xbf16, #tpu.memory_space<vmem>>, vector<1x8x384xbf16>
    %145 = vector.shape_cast %144 : vector<1x8x384xbf16> to vector<8x384xbf16>
    %c384 = arith.constant 384 : index
    %c0_153 = arith.constant 0 : index
    %146 = vector.load %arg7[%c384, %c0_153] : memref<392x384xbf16, #tpu.memory_space<vmem>>, vector<8x384xbf16>
    tpu.vector_store %arg7[%c384, %c0_153], %145 {strides = array<i32>} : memref<392x384xbf16, #tpu.memory_space<vmem>>, vector<8x384xbf16>,
    %c0_154 = arith.constant 0 : index
    %c0_155 = arith.constant 0 : index
    %147 = vector.load %arg2[%c0_154, %c0_155] : memref<96x392xbf16, #tpu.memory_space<vmem>>, vector<96x392xbf16>
    %c0_156 = arith.constant 0 : index
    %c0_157 = arith.constant 0 : index
    %148 = vector.load %arg7[%c0_156, %c0_157] : memref<392x384xbf16, #tpu.memory_space<vmem>>, vector<392x384xbf16>
    %cst = arith.constant dense<0.000000e+00> : vector<96x384xf32>
    %149 = tpu.matmul %147, %148, %cst {dimension_numbers = #tpu.dot_dimension_numbers<[1], [0], [0], [1], [0, 0, 1, 1], [], []>} : vector<96x392xbf16>, vector<392x384xbf16>, vector<96x384xf32> -> vector<96x384xf32>
    %c0_158 = arith.constant 0 : index
    %c0_159 = arith.constant 0 : index
    %150 = vector.load %arg3[%c0_158, %c0_159] : memref<96x1xf32, #tpu.memory_space<vmem>>, vector<96x1xf32>
    %151 = vector.broadcast %150 : vector<96x1xf32> to vector<96x384xf32>
    %152 = arith.addf %149, %151 : vector<96x384xf32>
    %cst_160 = arith.constant 0.000000e+00 : f32
    %153 = vector.broadcast %cst_160 : f32 to vector<96x384xf32>
    %154 = arith.cmpf ogt, %152, %153 : vector<96x384xf32>
    %cst_161 = arith.constant 2.000000e-01 : f32
    %155 = vector.broadcast %cst_161 : f32 to vector<96x384xf32>
    %156 = arith.mulf %155, %152 : vector<96x384xf32>
    %157 = arith.select %154, %152, %156 : vector<96x384xi1>, vector<96x384xf32>
    %158 = arith.truncf %157 : vector<96x384xf32> to vector<96x384xbf16>
    %c0_162 = arith.constant 0 : index
    %c0_163 = arith.constant 0 : index
    %159 = vector.load %arg4[%c0_162, %c0_163] : memref<32x96xbf16, #tpu.memory_space<vmem>>, vector<32x96xbf16>
    %cst_164 = arith.constant dense<0.000000e+00> : vector<32x384xf32>
    %160 = tpu.matmul %159, %158, %cst_164 {dimension_numbers = #tpu.dot_dimension_numbers<[1], [0], [0], [1], [0, 0, 1, 1], [], []>} : vector<32x96xbf16>, vector<96x384xbf16>, vector<32x384xf32> -> vector<32x384xf32>
    %c0_165 = arith.constant 0 : index
    %c0_166 = arith.constant 0 : index
    %161 = vector.load %arg5[%c0_165, %c0_166] : memref<32x1xf32, #tpu.memory_space<vmem>>, vector<32x1xf32>
    %162 = vector.broadcast %161 : vector<32x1xf32> to vector<32x384xf32>
    %163 = arith.addf %160, %162 : vector<32x384xf32>
    %cst_167 = arith.constant 0.000000e+00 : f32
    %164 = vector.broadcast %cst_167 : f32 to vector<32x384xf32>
    %165 = arith.cmpf ogt, %163, %164 : vector<32x384xf32>
    %cst_168 = arith.constant 2.000000e-01 : f32
    %166 = vector.broadcast %cst_168 : f32 to vector<32x384xf32>
    %167 = arith.mulf %166, %163 : vector<32x384xf32>
    %168 = arith.select %165, %163, %167 : vector<32x384xi1>, vector<32x384xf32>
    %c0_169 = arith.constant 0 : index
    %c0_170 = arith.constant 0 : index
    %c0_171 = arith.constant 0 : index
    %169 = vector.load %arg6[%c0_169, %c0_170, %c0_171] : memref<1x32x384xf32, #tpu.memory_space<vmem>>, vector<1x32x384xf32>
    %170 = vector.shape_cast %169 : vector<1x32x384xf32> to vector<32x384xf32>
    %171 = vector.shape_cast %168 : vector<32x384xf32> to vector<1x32x384xf32>
    tpu.vector_store %arg6[%c0_169, %c0_170, %c0_171], %171 {strides = array<i32>} : memref<1x32x384xf32, #tpu.memory_space<vmem>>, vector<1x32x384xf32>,
    return
  }
  func.func @transform_0(%arg0: i32) -> (i32, i32, i32) {
    %c0_i32 = arith.constant 0 : i32
    %c0_i32_0 = arith.constant 0 : i32
    %c0_i32_1 = arith.constant 0 : i32
    return %arg0, %c0_i32, %c0_i32_0 : i32, i32, i32
  }
  func.func @transform_1(%arg0: i32) -> (i32, i32) {
    %c0_i32 = arith.constant 0 : i32
    %c0_i32_0 = arith.constant 0 : i32
    %c0_i32_1 = arith.constant 0 : i32
    return %c0_i32, %c0_i32_0 : i32, i32
  }
  func.func @transform_2(%arg0: i32) -> (i32, i32) {
    %c0_i32 = arith.constant 0 : i32
    %c0_i32_0 = arith.constant 0 : i32
    %c0_i32_1 = arith.constant 0 : i32
    return %c0_i32, %c0_i32_0 : i32, i32
  }
  func.func @transform_3(%arg0: i32) -> (i32, i32) {
    %c0_i32 = arith.constant 0 : i32
    %c0_i32_0 = arith.constant 0 : i32
    %c0_i32_1 = arith.constant 0 : i32
    return %c0_i32, %c0_i32_0 : i32, i32
  }
  func.func @transform_4(%arg0: i32) -> (i32, i32) {
    %c0_i32 = arith.constant 0 : i32
    %c0_i32_0 = arith.constant 0 : i32
    %c0_i32_1 = arith.constant 0 : i32
    return %c0_i32, %c0_i32_0 : i32, i32
  }
  func.func @transform_5(%arg0: i32) -> (i32, i32, i32) {
    %c0_i32 = arith.constant 0 : i32
    %c0_i32_0 = arith.constant 0 : i32
    %c0_i32_1 = arith.constant 0 : i32
    return %arg0, %c0_i32, %c0_i32_0 : i32, i32, i32
  }
}

</mosaic_0001>

<bundles_post_ra>
// kernel: msdc_forward.1
= control target key start
LH: loop header
LB: loop body
LE: loop exit
PB: predicated region body
PF: predicated region fallthrough
CT: control target
= control target key end

     0   :  { %s3026_s18 = smov 0   ;;  %s3465_s0 = inlined_call_operand.vmem [shape: bf16[2,8,576], index: 0, kind: input, shape index: {}]   ;;  %s3466_s1 = inlined_call_operand.vmem [shape: bf16[96,392], index: 1, kind: input, shape index: {}]   ;;  %s3467_s2 = inlined_call_operand.vmem [shape: f32[96,1], index: 2, kind: input, shape index: {}]   ;;  %s3468_s3 = inlined_call_operand.vmem [shape: bf16[32,96], index: 3, kind: input, shape index: {}]   ;;  %s3469_s4 = inlined_call_operand.vmem [shape: f32[32,1], index: 4, kind: input, shape index: {}]   ;;  %s3470_s5 = inlined_call_operand.vmem [shape: f32[2,32,384], index: 5, kind: output, shape index: {}]  }
   0x1 LB: > { %s2562_s19 = sadd.s32 4294967295, %s2944_s18   ;;  %p2566_p0 = scmp.ge.s32.totalorder %s2944_s18, 1  ;;  %s2944_s18 = sphi %s3026_s18, %s15_s18  }
   0x2   : > { %p187_p1 = scmp.lt.s32.totalorder %s2944_s18, 3 }
   0x4   : > { %p188_p2 = pnand %p2566_p0, %p187_p1 }
   0x5   : > { %p215_p3 = scmp.lt.s32.totalorder (!%p188_p2), %s2562_s19, 1  ;;  %s2946_s24 = smov (!%p188_p2), 106   ;;  %vm236_vm0 = vcmask (!%p188_p2), 1043456   ;;  %vm256_vm1 = vcmask (!%p188_p2), 867328   ;;  %vm238_vm2 = vcmask (!%p188_p2), 875520   ;;  %vm274_vm3 = vcmask (!%p188_p2), 859136  }
   0x6   : > { %191 = sbr.rel (%p188_p2) target bundleno = 847 (0x34f), region = 40  ;;  %s2947_s25 = smov (!%p188_p2), 107   ;;  %v2893_v22 = vld [vmem:[%s3466_s1 + $0x4] ss:$16 sps:$4 sm:$0xff] (!%p188_p2)   ;;  %vm292_vm4 = vcmask (!%p188_p2), 850944   ;;  %vm310_vm5 = vcmask (!%p188_p2), 842752  }
   0x7   : > { %s2948_s26 = smov (!%p188_p2), 105   ;;  %s2949_s27 = smov (!%p188_p2), 104   ;;  %2056 = vmatprep.mubr.bf16.mxu1 (!%p188_p2), %v2893_v22  ;;  %1870 = vmatprep.mubr.bf16.mxu0 (!%p188_p2), %v2893_v22  ;;  %v2979_v39 = vmov (!%p188_p2), 0   ;;  %vm328_vm6 = vcmask (!%p188_p2), 834560   ;;  %vm346_vm7 = vcmask (!%p188_p2), 826368   ;;  %vm364_vm8 = vcmask (!%p188_p2), 678912  }
   0x8   : > { %s2950_s28 = smov (!%p188_p2), 103   ;;  %s2951_s29 = smov (!%p188_p2), 102   ;;  %2874 = vset.pattern.permute.xlu1 (!%p188_p2), %v2979_v39  ;;  %2873 = vset.pattern.permute.xlu0 (!%p188_p2), %v2979_v39  ;;  %vm382_vm9 = vcmask (!%p188_p2), 670720   ;;  %vm400_vm10 = vcmask (!%p188_p2), 662528   ;;  %vm418_vm11 = vcmask (!%p188_p2), 654336   ;;  %vm436_vm12 = vcmask (!%p188_p2), 646144  }
   0x9   : > { %s2952_s30 = smov (!%p188_p2), 101   ;;  %s2953_s6 = smov (!%p188_p2), 83   ;;  %vm454_vm13 = vcmask (!%p188_p2), 637952   ;;  %vm472_vm14 = vcmask (!%p188_p2), 629760   ;;  %vm490_vm15 = vcmask (!%p188_p2), 482304  }
   0xa   : > { %s2954_s7 = smov (!%p188_p2), 82   ;;  %s2955_s8 = smov (!%p188_p2), 81  }
   0xb   : > { %s2956_s9 = smov (!%p188_p2), 80   ;;  %s2957_s10 = smov (!%p188_p2), 79  }
   0xc   : > { %s2958_s11 = smov (!%p188_p2), 78   ;;  %s2959_s12 = smov (!%p188_p2), 77  }
   0xd   : > { %s3472_s19 = smov (!%p215_p3, %s2562_s19), 1  ;;  %s2960_s13 = smov 59  }
   0xe   : > { %s2813_s20 = smul.u32 20, %s3472_s19  ;;  %s2961_s14 = smov 58  }
   0xf   : > { %s2962_s15 = smov 57   ;;  %s2963_s16 = smov 56  }
  0x10   : > { %s3040_s23 = scalar_lea.vmem %s3465_s0, %s2813_s20  ;;  %s2964_s17 = smov 55  }
  0x11   : > { %v3043_v0 = vld [vmem:[%s3040_s23] sm:$0xff]  ;;  %v3046_v1 = vld [vmem:[%s3040_s23 + $0x8] sm:$0xff]  ;;  %s2965_s20 = smov 54   ;;  %s2966_s21 = smov 53  }
  0x12   : > { %249 = vrot.lane.b32.xlu1 %v3043_v0, %s2946_s24  ;;  %230 = vrot.lane.b32.xlu0 %v3043_v0, %s2947_s25  ;;  %s2967_s22 = smov 35   ;;  %v3134_v49 = vld [vmem:[%s3040_s23 + $0xc] sm:$0xff]  ;;  %v3137_v50 = vld [vmem:[%s3040_s23 + $0x4] sm:$0xff]  ;;  %s2983_s23 = smov 114  }
  0x16   : > { %251 = vrot.lane.b32.xlu1 %v3046_v1, %s2946_s24  ;;  %232 = vrot.lane.b32.xlu0 %v3046_v1, %s2947_s25  ;;  %s2968_s24 = smov 34   ;;  %s2969_s25 = smov 33  }
  0x1a   : > { %269 = vrot.lane.b32.xlu1 %v3046_v1, %s2948_s26  ;;  %267 = vrot.lane.b32.xlu0 %v3043_v0, %s2948_s26  ;;  %s2970_s26 = smov 32  }
  0x1e   : > { %287 = vrot.lane.b32.xlu1 %v3046_v1, %s2949_s27  ;;  %285 = vrot.lane.b32.xlu0 %v3043_v0, %s2949_s27  ;;  %s2971_s27 = smov 31  }
  0x22   : > { %305 = vrot.lane.b32.xlu1 %v3046_v1, %s2950_s28  ;;  %303 = vrot.lane.b32.xlu0 %v3043_v0, %s2950_s28  ;;  %s2972_s28 = smov 30  }
  0x26   : > { %323 = vrot.lane.b32.xlu1 %v3046_v1, %s2951_s29  ;;  %321 = vrot.lane.b32.xlu0 %v3043_v0, %s2951_s29  ;;  %s2973_s29 = smov 29  }
  0x2a   : > { %341 = vrot.lane.b32.xlu1 %v3046_v1, %s2952_s30  ;;  %339 = vrot.lane.b32.xlu0 %v3043_v0, %s2952_s30  ;;  %s2974_s30 = smov 11  }
  0x2e   : > { %359 = vrot.lane.b32.xlu1 %v3046_v1, %s2953_s6  ;;  %357 = vrot.lane.b32.xlu0 %v3043_v0, %s2953_s6  ;;  %s2975_s6 = smov 10  }
  0x32   : > { %377 = vrot.lane.b32.xlu1 %v3046_v1, %s2954_s7  ;;  %375 = vrot.lane.b32.xlu0 %v3043_v0, %s2954_s7  ;;  %s2976_s7 = smov 9  }
  0x36   : > { %395 = vrot.lane.b32.xlu1 %v3046_v1, %s2955_s8  ;;  %393 = vrot.lane.b32.xlu0 %v3043_v0, %s2955_s8 }
  0x3a   : > { %413 = vrot.lane.b32.xlu1 %v3046_v1, %s2956_s9  ;;  %411 = vrot.lane.b32.xlu0 %v3043_v0, %s2956_s9 }
  0x3e   : > { %431 = vrot.lane.b32.xlu1 %v3046_v1, %s2957_s10  ;;  %429 = vrot.lane.b32.xlu0 %v3043_v0, %s2957_s10  ;;  %s2977_s10 = smov 8  }
  0x42   : > { %449 = vrot.lane.b32.xlu1 %v3046_v1, %s2958_s11  ;;  %447 = vrot.lane.b32.xlu0 %v3043_v0, %s2958_s11  ;;  %s2978_s11 = smov 7  }
  0x46   : > { %467 = vrot.lane.b32.xlu1 %v3046_v1, %s2959_s12  ;;  %465 = vrot.lane.b32.xlu0 %v3043_v0, %s2959_s12  ;;  %s2980_s12 = smov 6  }
  0x4a   : > { %485 = vrot.lane.b32.xlu1 %v3046_v1, %s2960_s13  ;;  %483 = vrot.lane.b32.xlu0 %v3043_v0, %s2960_s13  ;;  %s2981_s13 = smov 5  }
  0x4e   : > { %503 = vrot.lane.b32.xlu1 %v3046_v1, %s2961_s14  ;;  %501 = vrot.lane.b32.xlu0 %v3043_v0, %s2961_s14  ;;  %s2982_s14 = smov 115  }
  0x52   : > { %521 = vrot.lane.b32.xlu1 %v3046_v1, %s2962_s15  ;;  %519 = vrot.lane.b32.xlu0 %v3043_v0, %s2962_s15  ;;  %s2984_s15 = smov 113  }
  0x56   : > { %539 = vrot.lane.b32.xlu1 %v3046_v1, %s2963_s16  ;;  %537 = vrot.lane.b32.xlu0 %v3043_v0, %s2963_s16  ;;  %s2985_s16 = smov 112  }
  0x5a   : > { %557 = vrot.lane.b32.xlu1 %v3046_v1, %s2964_s17  ;;  %555 = vrot.lane.b32.xlu0 %v3043_v0, %s2964_s17  ;;  %s2986_s17 = smov 111  }
  0x5e   : > { %575 = vrot.lane.b32.xlu1 %v3046_v1, %s2965_s20  ;;  %573 = vrot.lane.b32.xlu0 %v3043_v0, %s2965_s20  ;;  %s2987_s20 = smov 110  }
  0x62   : > { %593 = vrot.lane.b32.xlu1 %v3046_v1, %s2966_s21  ;;  %591 = vrot.lane.b32.xlu0 %v3043_v0, %s2966_s21  ;;  %s2988_s21 = smov 109  }
  0x66   : > { %611 = vrot.lane.b32.xlu1 %v3046_v1, %s2967_s22  ;;  %609 = vrot.lane.b32.xlu0 %v3043_v0, %s2967_s22  ;;  %s2989_s22 = smov 91  }
  0x6a   : > { %629 = vrot.lane.b32.xlu1 %v3046_v1, %s2968_s24  ;;  %627 = vrot.lane.b32.xlu0 %v3043_v0, %s2968_s24  ;;  %s2990_s24 = smov 90  }
  0x6e   : > { %647 = vrot.lane.b32.xlu1 %v3046_v1, %s2969_s25  ;;  %645 = vrot.lane.b32.xlu0 %v3043_v0, %s2969_s25  ;;  %s2991_s25 = smov 89  }
  0x72   : > { %665 = vrot.lane.b32.xlu1 %v3046_v1, %s2970_s26  ;;  %663 = vrot.lane.b32.xlu0 %v3043_v0, %s2970_s26  ;;  %s2992_s26 = smov 88  }
  0x76   : > { %683 = vrot.lane.b32.xlu1 %v3046_v1, %s2971_s27  ;;  %681 = vrot.lane.b32.xlu0 %v3043_v0, %s2971_s27  ;;  %s2993_s27 = smov 87  }
  0x7a   : > { %701 = vrot.lane.b32.xlu1 %v3046_v1, %s2972_s28  ;;  %699 = vrot.lane.b32.xlu0 %v3043_v0, %s2972_s28  ;;  %s2994_s28 = smov 86  }
  0x7e   : > { %719 = vrot.lane.b32.xlu1 %v3046_v1, %s2973_s29  ;;  %717 = vrot.lane.b32.xlu0 %v3043_v0, %s2973_s29  ;;  %s2995_s29 = smov 85  }
  0x82   : > { %737 = vrot.lane.b32.xlu1 %v3046_v1, %s2974_s30  ;;  %735 = vrot.lane.b32.xlu0 %v3043_v0, %s2974_s30 }
  0x84   : > { %v250_v2 = vpop.permute.xlu1 %249  ;;  %v231_v3 = vpop.permute.xlu0 %230 }
  0x85   : > { %v253_v6 = vrot.slane %v250_v2, 4  ;;  %v234_v7 = vrot.slane %v231_v3, 4 }
  0x86   : > { %755 = vrot.lane.b32.xlu1 %v3046_v1, %s2975_s6  ;;  %753 = vrot.lane.b32.xlu0 %v3043_v0, %s2975_s6 }
  0x88   : > { %v252_v4 = vpop.permute.xlu1 %251  ;;  %v233_v5 = vpop.permute.xlu0 %232 }
  0x89   : > { %v254_v8 = vrot.slane %v252_v4, 4  ;;  %v235_v9 = vrot.slane %v233_v5, 4 }
  0x8a   : > { %773 = vrot.lane.b32.xlu1 %v3046_v1, %s2976_s7  ;;  %771 = vrot.lane.b32.xlu0 %v3043_v0, %s2976_s7 }
  0x8b   : > { %v255_v10 = vsel %vm236_vm0, %v253_v6, %v254_v8  ;;  %v258_v11 = vsel %vm256_vm1, %v252_v4, %v254_v8  ;;  %v237_v12 = vsel %vm236_vm0, %v234_v7, %v235_v9  ;;  %v240_v13 = vsel %vm238_vm2, %v233_v5, %v235_v9 }
  0x8c   : > { %v257_v14 = vsel %vm256_vm1, %v250_v2, %v255_v10  ;;  %262 = vst [vmem:[#allocation2 + $0x14] sm:$0xf] %v258_v11  ;;  %v239_v15 = vsel %vm238_vm2, %v231_v3, %v237_v12  ;;  %244 = vst [vmem:[#allocation2 + $0x8] sm:$0xf] %v240_v13  ;;  %v270_v16 = vpop.permute.xlu1 %269  ;;  %v268_v17 = vpop.permute.xlu0 %267  ;;  %vm508_vm1 = vcmask 474112   ;;  %vm526_vm2 = vcmask 465920  }
  0x8d   : > { %v272_v18 = vrot.slane %v270_v16, 4  ;;  %v271_v19 = vrot.slane %v268_v17, 4  ;;  %v2594_v20 = vcombine.high %v239_v15, %v257_v14  ;;  %v2593_v21 = vcombine.low %v239_v15, %v257_v14 }
  0x8e   : > { %791 = vrot.lane.b32.xlu1 %v3046_v1, %s2977_s10  ;;  %789 = vrot.lane.b32.xlu0 %v3043_v0, %s2977_s10 }
  0x8f   : > { %v276_v23 = vsel %vm274_vm3, %v270_v16, %v272_v18  ;;  %v273_v24 = vsel %vm236_vm0, %v271_v19, %v272_v18  ;;  %1838 = vmatprep.subr.bf16.mxu0 %v2594_v20 }
  0x90   : > { %280 = vst [vmem:[#allocation2 + $0x20] sm:$0xf] %v276_v23  ;;  %v275_v25 = vsel %vm274_vm3, %v268_v17, %v273_v24  ;;  %v288_v26 = vpop.permute.xlu1 %287  ;;  %v286_v27 = vpop.permute.xlu0 %285  ;;  %1839 = vmatpush1.bf16.msra.mxu0 %v2593_v21  ;;  %vm544_vm3 = vcmask 457728  }
  0x91   : > { %v290_v28 = vrot.slane %v288_v26, 4  ;;  %v289_v29 = vrot.slane %v286_v27, 4 }
  0x92   : > { %809 = vrot.lane.b32.xlu1 %v3046_v1, %s2978_s11  ;;  %807 = vrot.lane.b32.xlu0 %v3043_v0, %s2978_s11 }
  0x93   : > { %v294_v30 = vsel %vm292_vm4, %v288_v26, %v290_v28  ;;  %v291_v31 = vsel %vm236_vm0, %v289_v29, %v290_v28 }
  0x94   : > { %298 = vst [vmem:[#allocation2 + $0x2c] sm:$0xf] %v294_v30  ;;  %v293_v32 = vsel %vm292_vm4, %v286_v27, %v291_v31  ;;  %v306_v33 = vpop.permute.xlu1 %305  ;;  %v304_v34 = vpop.permute.xlu0 %303  ;;  %vm562_vm4 = vcmask 449536  }
  0x95   : > { %v308_v35 = vrot.slane %v306_v33, 4  ;;  %v307_v36 = vrot.slane %v304_v34, 4  ;;  %v2597_v37 = vcombine.high %v275_v25, %v293_v32  ;;  %v2596_v38 = vcombine.low %v275_v25, %v293_v32 }
  0x96   : > { %827 = vrot.lane.b32.xlu1 %v3046_v1, %s2980_s12  ;;  %825 = vrot.lane.b32.xlu0 %v3043_v0, %s2980_s12 }
  0x97   : > { %v312_v40 = vsel %vm310_vm5, %v306_v33, %v308_v35  ;;  %v309_v41 = vsel %vm236_vm0, %v307_v36, %v308_v35  ;;  %1840 = vmatprep.subr.bf16.mxu0 %v2597_v37 }
  0x98   : > { %316 = vst [vmem:[#allocation2 + $0x38] sm:$0xf] %v312_v40  ;;  %v311_v42 = vsel %vm310_vm5, %v304_v34, %v309_v41  ;;  %v324_v43 = vpop.permute.xlu1 %323  ;;  %v322_v44 = vpop.permute.xlu0 %321  ;;  %1841 = vmatpush1.bf16.msra.mxu0 %v2596_v38  ;;  %vm580_vm5 = vcmask 441344  }
  0x99   : > { %v326_v45 = vrot.slane %v324_v43, 4  ;;  %v325_v46 = vrot.slane %v322_v44, 4 }
  0x9a   : > { %845 = vrot.lane.b32.xlu1 %v3046_v1, %s2981_s13  ;;  %843 = vrot.lane.b32.xlu0 %v3043_v0, %s2981_s13 }
  0x9b   : > { %v330_v47 = vsel %vm328_vm6, %v324_v43, %v326_v45  ;;  %v327_v48 = vsel %vm236_vm0, %v325_v46, %v326_v45 }
  0x9c   : > { %334 = vst [vmem:[#allocation2 + $0x44] sm:$0xf] %v330_v47  ;;  %v329_v51 = vsel %vm328_vm6, %v322_v44, %v327_v48  ;;  %v342_v52 = vpop.permute.xlu1 %341  ;;  %v340_v53 = vpop.permute.xlu0 %339  ;;  %vm598_vm6 = vcmask 433152  }
  0x9d   : > { %v344_v54 = vrot.slane %v342_v52, 4  ;;  %v343_v55 = vrot.slane %v340_v53, 4  ;;  %v2600_v56 = vcombine.high %v311_v42, %v329_v51  ;;  %v2599_v57 = vcombine.low %v311_v42, %v329_v51 }
  0x9e   : > { %863 = vrot.lane.b32.xlu1 %v3134_v49, %s2982_s14  ;;  %861 = vrot.lane.b32.xlu0 %v3137_v50, %s2982_s14 }
  0x9f   : > { %v348_v58 = vsel %vm346_vm7, %v342_v52, %v344_v54  ;;  %v345_v59 = vsel %vm236_vm0, %v343_v55, %v344_v54  ;;  %1842 = vmatprep.subr.bf16.mxu0 %v2600_v56 }
  0xa0   : > { %352 = vst [vmem:[#allocation2 + $0x50] sm:$0xf] %v348_v58  ;;  %v347_v60 = vsel %vm346_vm7, %v340_v53, %v345_v59  ;;  %v360_v61 = vpop.permute.xlu1 %359  ;;  %v358_v62 = vpop.permute.xlu0 %357  ;;  %1843 = vmatpush1.bf16.msra.mxu0 %v2599_v57  ;;  %vm616_vm7 = vcmask 285696  }
  0xa1   : > { %v362_v63 = vrot.slane %v360_v61, 4  ;;  %v361_v0 = vrot.slane %v358_v62, 4 }
  0xa2   : > { %881 = vrot.lane.b32.xlu1 %v3134_v49, %s2983_s23  ;;  %879 = vrot.lane.b32.xlu0 %v3137_v50, %s2983_s23 }
  0xa3   : > { %v366_v1 = vsel %vm364_vm8, %v360_v61, %v362_v63  ;;  %v363_v2 = vsel %vm236_vm0, %v361_v0, %v362_v63 }
  0xa4   : > { %370 = vst [vmem:[#allocation2 + $0x5c] sm:$0xf] %v366_v1  ;;  %v365_v3 = vsel %vm364_vm8, %v358_v62, %v363_v2  ;;  %v378_v4 = vpop.permute.xlu1 %377  ;;  %v376_v5 = vpop.permute.xlu0 %375  ;;  %vm634_vm8 = vcmask 277504  }
  0xa5   : > { %v380_v6 = vrot.slane %v378_v4, 4  ;;  %v379_v7 = vrot.slane %v376_v5, 4  ;;  %v2603_v8 = vcombine.high %v347_v60, %v365_v3  ;;  %v2602_v9 = vcombine.low %v347_v60, %v365_v3 }
  0xa6   : > { %899 = vrot.lane.b32.xlu1 %v3134_v49, %s2984_s15  ;;  %897 = vrot.lane.b32.xlu0 %v3137_v50, %s2984_s15 }
  0xa7   : > { %v384_v10 = vsel %vm382_vm9, %v378_v4, %v380_v6  ;;  %v381_v11 = vsel %vm236_vm0, %v379_v7, %v380_v6  ;;  %1844 = vmatprep.subr.bf16.mxu0 %v2603_v8 }
  0xa8   : > { %388 = vst [vmem:[#allocation2 + $0x68] sm:$0xf] %v384_v10  ;;  %v383_v12 = vsel %vm382_vm9, %v376_v5, %v381_v11  ;;  %v396_v13 = vpop.permute.xlu1 %395  ;;  %v394_v14 = vpop.permute.xlu0 %393  ;;  %1845 = vmatpush1.bf16.msra.mxu0 %v2602_v9  ;;  %vm652_vm9 = vcmask 269312  }
  0xa9   : > { %v398_v15 = vrot.slane %v396_v13, 4  ;;  %v397_v16 = vrot.slane %v394_v14, 4 }
  0xaa   : > { %917 = vrot.lane.b32.xlu1 %v3134_v49, %s2985_s16  ;;  %915 = vrot.lane.b32.xlu0 %v3137_v50, %s2985_s16 }
  0xab   : > { %v402_v17 = vsel %vm400_vm10, %v396_v13, %v398_v15  ;;  %v399_v18 = vsel %vm236_vm0, %v397_v16, %v398_v15 }
  0xac   : > { %406 = vst [vmem:[#allocation2 + $0x74] sm:$0xf] %v402_v17  ;;  %v401_v19 = vsel %vm400_vm10, %v394_v14, %v399_v18  ;;  %v414_v20 = vpop.permute.xlu1 %413  ;;  %v412_v21 = vpop.permute.xlu0 %411  ;;  %vm670_vm10 = vcmask 261120  }
  0xad   : > { %v416_v22 = vrot.slane %v414_v20, 4  ;;  %v415_v23 = vrot.slane %v412_v21, 4  ;;  %v2606_v24 = vcombine.high %v383_v12, %v401_v19  ;;  %v2605_v25 = vcombine.low %v383_v12, %v401_v19 }
  0xae   : > { %935 = vrot.lane.b32.xlu1 %v3134_v49, %s2986_s17  ;;  %933 = vrot.lane.b32.xlu0 %v3137_v50, %s2986_s17  ;;  %s2814_s17 = smul.u32 96, %s3472_s19 }
  0xaf   : > { %v420_v26 = vsel %vm418_vm11, %v414_v20, %v416_v22  ;;  %v417_v27 = vsel %vm236_vm0, %v415_v23, %v416_v22  ;;  %1846 = vmatprep.subr.bf16.mxu0 %v2606_v24 }
  0xb0   : > { %424 = vst [vmem:[#allocation2 + $0x80] sm:$0xf] %v420_v26  ;;  %v419_v28 = vsel %vm418_vm11, %v412_v21, %v417_v27  ;;  %v432_v29 = vpop.permute.xlu1 %431  ;;  %v430_v30 = vpop.permute.xlu0 %429  ;;  %1847 = vmatpush1.bf16.msra.mxu0 %v2605_v25  ;;  %vm688_vm11 = vcmask 252928  }
  0xb1   : > { %v434_v31 = vrot.slane %v432_v29, 4  ;;  %v433_v32 = vrot.slane %v430_v30, 4 }
  0xb2   : > { %953 = vrot.lane.b32.xlu1 %v3134_v49, %s2987_s20  ;;  %951 = vrot.lane.b32.xlu0 %v3137_v50, %s2987_s20 }
  0xb3   : > { %v438_v33 = vsel %vm436_vm12, %v432_v29, %v434_v31  ;;  %v435_v34 = vsel %vm236_vm0, %v433_v32, %v434_v31 }
  0xb4   : > { %442 = vst [vmem:[#allocation2 + $0x8c] sm:$0xf] %v438_v33  ;;  %v437_v35 = vsel %vm436_vm12, %v430_v30, %v435_v34  ;;  %v450_v36 = vpop.permute.xlu1 %449  ;;  %v448_v37 = vpop.permute.xlu0 %447  ;;  %vm706_vm12 = vcmask 244736  }
  0xb5   : > { %v452_v38 = vrot.slane %v450_v36, 4  ;;  %v451_v40 = vrot.slane %v448_v37, 4  ;;  %v2609_v41 = vcombine.high %v419_v28, %v437_v35  ;;  %v2608_v42 = vcombine.low %v419_v28, %v437_v35 }
  0xb6   : > { %971 = vrot.lane.b32.xlu1 %v3134_v49, %s2988_s21  ;;  %969 = vrot.lane.b32.xlu0 %v3137_v50, %s2988_s21 }
  0xb7   : > { %v456_v43 = vsel %vm454_vm13, %v450_v36, %v452_v38  ;;  %v453_v44 = vsel %vm236_vm0, %v451_v40, %v452_v38  ;;  %1848 = vmatprep.subr.bf16.mxu0 %v2609_v41 }
  0xb8   : > { %460 = vst [vmem:[#allocation2 + $0x98] sm:$0xf] %v456_v43  ;;  %v455_v45 = vsel %vm454_vm13, %v448_v37, %v453_v44  ;;  %v468_v46 = vpop.permute.xlu1 %467  ;;  %v466_v47 = vpop.permute.xlu0 %465  ;;  %1849 = vmatpush1.bf16.msra.mxu0 %v2608_v42  ;;  %v2876_v43 = vld [vmem:[#allocation2 + $0x8] ss:$12 sps:$4 sm:$0xff]   ;;  %vm724_vm13 = vcmask 236544  }
  0xb9   : > { %v470_v48 = vrot.slane %v468_v46, 4  ;;  %v469_v51 = vrot.slane %v466_v47, 4 }
  0xba   : > { %989 = vrot.lane.b32.xlu1 %v3134_v49, %s2989_s22  ;;  %987 = vrot.lane.b32.xlu0 %v3137_v50, %s2989_s22  ;;  %s3448_s22 = scalar_lea.vmem %s3470_s5, %s2814_s17 }
  0xbb   : > { %v474_v52 = vsel %vm472_vm14, %v468_v46, %v470_v48  ;;  %v471_v53 = vsel %vm236_vm0, %v469_v51, %v470_v48 }
  0xbc   : > { %478 = vst [vmem:[#allocation2 + $0xa4] sm:$0xf] %v474_v52  ;;  %v473_v54 = vsel %vm472_vm14, %v466_v47, %v471_v53  ;;  %v486_v55 = vpop.permute.xlu1 %485  ;;  %v484_v56 = vpop.permute.xlu0 %483  ;;  %vm742_vm14 = vcmask 89088  }
  0xbd   : > { %v488_v57 = vrot.slane %v486_v55, 4  ;;  %v487_v58 = vrot.slane %v484_v56, 4  ;;  %v2612_v59 = vcombine.high %v455_v45, %v473_v54  ;;  %v2611_v60 = vcombine.low %v455_v45, %v473_v54 }
  0xbe   : > { %1007 = vrot.lane.b32.xlu1 %v3134_v49, %s2990_s24  ;;  %1005 = vrot.lane.b32.xlu0 %v3137_v50, %s2990_s24 }
  0xbf   : > { %v492_v61 = vsel %vm490_vm15, %v486_v55, %v488_v57  ;;  %v489_v62 = vsel %vm236_vm0, %v487_v58, %v488_v57  ;;  %1850 = vmatprep.subr.bf16.mxu0 %v2612_v59 }
  0xc0   : > { %496 = vst [vmem:[#allocation2 + $0xb0] sm:$0xf] %v492_v61  ;;  %v491_v63 = vsel %vm490_vm15, %v484_v56, %v489_v62  ;;  %v504_v0 = vpop.permute.xlu1 %503  ;;  %v502_v1 = vpop.permute.xlu0 %501  ;;  %1851 = vmatpush1.bf16.msra.mxu0 %v2611_v60  ;;  %v2878_v61 = vld [vmem:[#allocation2 + $0x20] ss:$12 sps:$4 sm:$0xff]   ;;  %vm760_vm15 = vcmask 80896  }
  0xc1   : > { %v506_v2 = vrot.slane %v504_v0, 4  ;;  %v505_v3 = vrot.slane %v502_v1, 4 }
  0xc2   : > { %1025 = vrot.lane.b32.xlu1 %v3134_v49, %s2991_s25  ;;  %1023 = vrot.lane.b32.xlu0 %v3137_v50, %s2991_s25 }
  0xc3   : > { %v510_v4 = vsel %vm508_vm1, %v504_v0, %v506_v2  ;;  %v507_v5 = vsel %vm236_vm0, %v505_v3, %v506_v2 }
  0xc4   : > { %514 = vst [vmem:[#allocation2 + $0xbc] sm:$0xf] %v510_v4  ;;  %v509_v6 = vsel %vm508_vm1, %v502_v1, %v507_v5  ;;  %v522_v7 = vpop.permute.xlu1 %521  ;;  %v520_v8 = vpop.permute.xlu0 %519  ;;  %vm778_vm1 = vcmask 72704  }
  0xc5   : > { %v524_v9 = vrot.slane %v522_v7, 4  ;;  %v523_v10 = vrot.slane %v520_v8, 4  ;;  %v2615_v11 = vcombine.high %v491_v63, %v509_v6  ;;  %v2614_v12 = vcombine.low %v491_v63, %v509_v6 }
  0xc6   : > { %1043 = vrot.lane.b32.xlu1 %v3134_v49, %s2992_s26  ;;  %1041 = vrot.lane.b32.xlu0 %v3137_v50, %s2992_s26 }
  0xc7   : > { %v528_v13 = vsel %vm526_vm2, %v522_v7, %v524_v9  ;;  %v525_v14 = vsel %vm236_vm0, %v523_v10, %v524_v9  ;;  %1852 = vmatprep.subr.bf16.mxu0 %v2615_v11 }
  0xc8   : > { %532 = vst [vmem:[#allocation2 + $0xc8] sm:$0xf] %v528_v13  ;;  %v527_v15 = vsel %vm526_vm2, %v520_v8, %v525_v14  ;;  %v540_v16 = vpop.permute.xlu1 %539  ;;  %v538_v17 = vpop.permute.xlu0 %537  ;;  %1853 = vmatpush1.bf16.msra.mxu0 %v2614_v12  ;;  %vm796_vm2 = vcmask 64512  }
  0xc9   : > { %v542_v18 = vrot.slane %v540_v16, 4  ;;  %v541_v19 = vrot.slane %v538_v17, 4 }
  0xca   : > { %1061 = vrot.lane.b32.xlu1 %v3134_v49, %s2993_s27  ;;  %1059 = vrot.lane.b32.xlu0 %v3137_v50, %s2993_s27 }
  0xcb   : > { %v546_v20 = vsel %vm544_vm3, %v540_v16, %v542_v18  ;;  %v543_v21 = vsel %vm236_vm0, %v541_v19, %v542_v18 }
  0xcc   : > { %550 = vst [vmem:[#allocation2 + $0xd4] sm:$0xf] %v546_v20  ;;  %v545_v22 = vsel %vm544_vm3, %v538_v17, %v543_v21  ;;  %v558_v23 = vpop.permute.xlu1 %557  ;;  %v556_v24 = vpop.permute.xlu0 %555  ;;  %vm814_vm3 = vcmask 56320  }
  0xcd   : > { %v560_v25 = vrot.slane %v558_v23, 4  ;;  %v559_v26 = vrot.slane %v556_v24, 4  ;;  %v2618_v27 = vcombine.high %v527_v15, %v545_v22  ;;  %v2617_v28 = vcombine.low %v527_v15, %v545_v22  ;;  %v2880_v15 = vld [vmem:[#allocation2 + $0x38] ss:$12 sps:$4 sm:$0xff]  }
  0xce   : > { %1079 = vrot.lane.b32.xlu1 %v3134_v49, %s2994_s28  ;;  %1077 = vrot.lane.b32.xlu0 %v3137_v50, %s2994_s28 }
  0xcf   : > { %v564_v29 = vsel %vm562_vm4, %v558_v23, %v560_v25  ;;  %v561_v30 = vsel %vm236_vm0, %v559_v26, %v560_v25  ;;  %1854 = vmatprep.subr.bf16.mxu0 %v2618_v27 }
  0xd0   : > { %568 = vst [vmem:[#allocation2 + $0xe0] sm:$0xf] %v564_v29  ;;  %v563_v31 = vsel %vm562_vm4, %v556_v24, %v561_v30  ;;  %v576_v32 = vpop.permute.xlu1 %575  ;;  %v574_v33 = vpop.permute.xlu0 %573  ;;  %1855 = vmatpush1.bf16.msra.mxu0 %v2617_v28  ;;  %vm832_vm4 = vcmask 48128  }
  0xd1   : > { %v578_v34 = vrot.slane %v576_v32, 4  ;;  %v577_v35 = vrot.slane %v574_v33, 4 }
  0xd2   : > { %1097 = vrot.lane.b32.xlu1 %v3134_v49, %s2995_s29  ;;  %1095 = vrot.lane.b32.xlu0 %v3137_v50, %s2995_s29 }
  0xd3   : > { %v582_v36 = vsel %vm580_vm5, %v576_v32, %v578_v34  ;;  %v579_v37 = vsel %vm236_vm0, %v577_v35, %v578_v34  ;;  %v2875_v38 = vld [vmem:[#allocation2 + $0xc8] ss:$12 sps:$4 sm:$0xff]  }
  0xd4   : > { %586 = vst [vmem:[#allocation2 + $0xec] sm:$0xf] %v582_v36  ;;  %v581_v40 = vsel %vm580_vm5, %v574_v33, %v579_v37  ;;  %v594_v41 = vpop.permute.xlu1 %593  ;;  %v592_v42 = vpop.permute.xlu0 %591  ;;  %2689 = vmatprep.subr.bf16.mxu1 %v2875_v38  ;;  %v2882_v33 = vld [vmem:[#allocation2 + $0x50] ss:$12 sps:$4 sm:$0xff]   ;;  %vm850_vm5 = vcmask 39936  }
  0xd5   : > { %v596_v44 = vrot.slane %v594_v41, 4  ;;  %v595_v45 = vrot.slane %v592_v42, 4  ;;  %v2621_v46 = vcombine.high %v563_v31, %v581_v40  ;;  %v2620_v47 = vcombine.low %v563_v31, %v581_v40  ;;  %2690 = vmatpush3.bf16.msra.mxu1 %v2876_v43 }
  0xd7   : > { %v600_v48 = vsel %vm598_vm6, %v594_v41, %v596_v44  ;;  %v597_v49 = vsel %vm236_vm0, %v595_v45, %v596_v44  ;;  %1856 = vmatprep.subr.bf16.mxu0 %v2621_v46 }
  0xd8   : > { %604 = vst [vmem:[#allocation2 + $0xf8] sm:$0xf] %v600_v48  ;;  %v599_v50 = vsel %vm598_vm6, %v592_v42, %v597_v49  ;;  %v612_v51 = vpop.permute.xlu1 %611  ;;  %v610_v52 = vpop.permute.xlu0 %609  ;;  %1857 = vmatpush1.bf16.msra.mxu0 %v2620_v47  ;;  %vm868_vm6 = vcmask 941056  }
  0xd9   : > { %v614_v53 = vrot.slane %v612_v51, 4  ;;  %v613_v54 = vrot.slane %v610_v52, 4 }
  0xdb   : > { %v618_v55 = vsel %vm616_vm7, %v612_v51, %v614_v53  ;;  %v615_v56 = vsel %vm236_vm0, %v613_v54, %v614_v53  ;;  %v2877_v57 = vld [vmem:[#allocation2 + $0xe0] ss:$12 sps:$4 sm:$0xff]  }
  0xdc   : > { %622 = vst [vmem:[#allocation2 + $0x104] sm:$0xf] %v618_v55  ;;  %v617_v58 = vsel %vm616_vm7, %v610_v52, %v615_v56  ;;  %v630_v59 = vpop.permute.xlu1 %629  ;;  %v628_v60 = vpop.permute.xlu0 %627  ;;  %2691 = vmatprep.subr.bf16.mxu1 %v2877_v57  ;;  %v2884_v52 = vld [vmem:[#allocation2 + $0x68] ss:$12 sps:$4 sm:$0xff]   ;;  %vm886_vm7 = vcmask 932864  }
  0xdd   : > { %v632_v62 = vrot.slane %v630_v59, 4  ;;  %v631_v63 = vrot.slane %v628_v60, 4  ;;  %v2624_v0 = vcombine.high %v599_v50, %v617_v58  ;;  %v2623_v1 = vcombine.low %v599_v50, %v617_v58  ;;  %2692 = vmatpush3.bf16.msra.mxu1 %v2878_v61 }
  0xdf   : > { %v636_v2 = vsel %vm634_vm8, %v630_v59, %v632_v62  ;;  %v633_v3 = vsel %vm236_vm0, %v631_v63, %v632_v62  ;;  %1858 = vmatprep.subr.bf16.mxu0 %v2624_v0 }
  0xe0   : > { %640 = vst [vmem:[#allocation2 + $0x110] sm:$0xf] %v636_v2  ;;  %v635_v4 = vsel %vm634_vm8, %v628_v60, %v633_v3  ;;  %v648_v5 = vpop.permute.xlu1 %647  ;;  %v646_v6 = vpop.permute.xlu0 %645  ;;  %1859 = vmatpush1.bf16.msra.mxu0 %v2623_v1  ;;  %vm904_vm8 = vcmask 924672  }
  0xe1   : > { %v650_v7 = vrot.slane %v648_v5, 4  ;;  %v649_v8 = vrot.slane %v646_v6, 4 }
  0xe3   : > { %v654_v9 = vsel %vm652_vm9, %v648_v5, %v650_v7  ;;  %v651_v10 = vsel %vm236_vm0, %v649_v8, %v650_v7  ;;  %v2879_v11 = vld [vmem:[#allocation2 + $0xf8] ss:$12 sps:$4 sm:$0xff]  }
  0xe4   : > { %658 = vst [vmem:[#allocation2 + $0x11c] sm:$0xf] %v654_v9  ;;  %v653_v12 = vsel %vm652_vm9, %v646_v6, %v651_v10  ;;  %v666_v13 = vpop.permute.xlu1 %665  ;;  %v664_v14 = vpop.permute.xlu0 %663  ;;  %2693 = vmatprep.subr.bf16.mxu1 %v2879_v11  ;;  %v2886_v6 = vld [vmem:[#allocation2 + $0x80] ss:$12 sps:$4 sm:$0xff]   ;;  %vm922_vm9 = vcmask 916480  }
  0xe5   : > { %v668_v16 = vrot.slane %v666_v13, 4  ;;  %v667_v17 = vrot.slane %v664_v14, 4  ;;  %v2627_v18 = vcombine.high %v635_v4, %v653_v12  ;;  %v2626_v19 = vcombine.low %v635_v4, %v653_v12  ;;  %2694 = vmatpush3.bf16.msra.mxu1 %v2880_v15  ;;  %v1232_v11 = vld [vmem:[%s3467_s2 + $0x8] sm:$0xff]  ;;  %v1231_v12 = vld [vmem:[%s3467_s2] sm:$0xff]  ;;  %v1233_v15 = vld [vmem:[%s3467_s2 + $0x10] sm:$0xff] }
  0xe6   : > { %1250 = vperm.xlu1 %2874, %v1232_v11   ;;  %1245 = vperm.xlu0 %2873, %v1231_v12  }
  0xe7   : > { %v672_v20 = vsel %vm670_vm10, %v666_v13, %v668_v16  ;;  %v669_v21 = vsel %vm236_vm0, %v667_v17, %v668_v16  ;;  %1860 = vmatprep.subr.bf16.mxu0 %v2627_v18 }
  0xe8   : > { %676 = vst [vmem:[#allocation2 + $0x128] sm:$0xf] %v672_v20  ;;  %v671_v22 = vsel %vm670_vm10, %v664_v14, %v669_v21  ;;  %v684_v23 = vpop.permute.xlu1 %683  ;;  %v682_v24 = vpop.permute.xlu0 %681  ;;  %1861 = vmatpush1.bf16.msra.mxu0 %v2626_v19  ;;  %v1234_v19 = vld [vmem:[%s3467_s2 + $0x18] sm:$0xff]  ;;  %vm940_vm10 = vcmask 908288  }
  0xe9   : > { %v686_v25 = vrot.slane %v684_v23, 4  ;;  %v685_v26 = vrot.slane %v682_v24, 4 }
  0xea   : > { %1255 = vperm.xlu1 %2874, %v1233_v15   ;;  %1260 = vperm.xlu0 %2873, %v1234_v19  }
  0xeb   : > { %v690_v27 = vsel %vm688_vm11, %v684_v23, %v686_v25  ;;  %v687_v28 = vsel %vm236_vm0, %v685_v26, %v686_v25  ;;  %v2881_v29 = vld [vmem:[#allocation2 + $0x110] ss:$12 sps:$4 sm:$0xff]   ;;  %v1235_v25 = vld [vmem:[%s3467_s2 + $0x20] sm:$0xff] }
  0xec   : > { %694 = vst [vmem:[#allocation2 + $0x134] sm:$0xf] %v690_v27  ;;  %v689_v30 = vsel %vm688_vm11, %v682_v24, %v687_v28  ;;  %v702_v31 = vpop.permute.xlu1 %701  ;;  %v700_v32 = vpop.permute.xlu0 %699  ;;  %2695 = vmatprep.subr.bf16.mxu1 %v2881_v29  ;;  %v2888_v29 = vld [vmem:[#allocation2 + $0x98] ss:$12 sps:$4 sm:$0xff]   ;;  %vm958_vm11 = vcmask 900096  }
  0xed   : > { %v704_v34 = vrot.slane %v702_v31, 4  ;;  %v703_v35 = vrot.slane %v700_v32, 4  ;;  %v2630_v36 = vcombine.high %v671_v22, %v689_v30  ;;  %v2629_v37 = vcombine.low %v671_v22, %v689_v30  ;;  %2696 = vmatpush3.bf16.msra.mxu1 %v2882_v33  ;;  %v1236_v30 = vld [vmem:[%s3467_s2 + $0x28] sm:$0xff] }
  0xee   : > { %1265 = vperm.xlu1 %2874, %v1235_v25   ;;  %1270 = vperm.xlu0 %2873, %v1236_v30  }
  0xef   : > { %v708_v38 = vsel %vm706_vm12, %v702_v31, %v704_v34  ;;  %v705_v40 = vsel %vm236_vm0, %v703_v35, %v704_v34  ;;  %1862 = vmatprep.subr.bf16.mxu0 %v2630_v36 }
  0xf0   : > { %712 = vst [vmem:[#allocation2 + $0x140] sm:$0xf] %v708_v38  ;;  %v707_v41 = vsel %vm706_vm12, %v700_v32, %v705_v40  ;;  %v720_v42 = vpop.permute.xlu1 %719  ;;  %v718_v43 = vpop.permute.xlu0 %717  ;;  %1863 = vmatpush1.bf16.msra.mxu0 %v2629_v37  ;;  %v2891_v37 = vld [vmem:[%s3466_s1] ss:$16 sps:$4 sm:$0xff]   ;;  %vm976_vm12 = vcmask 891904  }
  0xf1   : > { %v722_v44 = vrot.slane %v720_v42, 4  ;;  %v721_v45 = vrot.slane %v718_v43, 4  ;;  %v1237_v38 = vld [vmem:[%s3467_s2 + $0x30] sm:$0xff] }
  0xf2   : > { %1275 = vperm.xlu1 %2874, %v1237_v38  }
  0xf3   : > { %v726_v46 = vsel %vm724_vm13, %v720_v42, %v722_v44  ;;  %v723_v47 = vsel %vm236_vm0, %v721_v45, %v722_v44  ;;  %v2883_v48 = vld [vmem:[#allocation2 + $0x128] ss:$12 sps:$4 sm:$0xff]   ;;  %v1238_v44 = vld [vmem:[%s3467_s2 + $0x38] sm:$0xff] }
  0xf4   : > { %730 = vst [vmem:[#allocation2 + $0x14c] sm:$0xf] %v726_v46  ;;  %v725_v49 = vsel %vm724_vm13, %v718_v43, %v723_v47  ;;  %v738_v50 = vpop.permute.xlu1 %737  ;;  %v736_v51 = vpop.permute.xlu0 %735  ;;  %2697 = vmatprep.subr.bf16.mxu1 %v2883_v48  ;;  %v2897_v43 = vld [vmem:[%s3466_s1 + $0x24] ss:$16 sps:$4 sm:$0xff]   ;;  %1280 = vperm.xlu0 %2873, %v1238_v44   ;;  %vm994_vm13 = vcmask 744448  }
  0xf5   : > { %v740_v53 = vrot.slane %v738_v50, 4  ;;  %v739_v54 = vrot.slane %v736_v51, 4  ;;  %v2633_v55 = vcombine.high %v707_v41, %v725_v49  ;;  %v2632_v56 = vcombine.low %v707_v41, %v725_v49  ;;  %2698 = vmatpush3.bf16.msra.mxu1 %v2884_v52 }
  0xf7   : > { %v744_v57 = vsel %vm742_vm14, %v738_v50, %v740_v53  ;;  %v741_v58 = vsel %vm236_vm0, %v739_v54, %v740_v53  ;;  %1864 = vmatprep.subr.bf16.mxu0 %v2633_v55  ;;  %v1239_v50 = vld [vmem:[%s3467_s2 + $0x40] sm:$0xff]  ;;  %v2890_v54 = vld [vmem:[#allocation2 + $0xb0] ss:$12 sps:$4 sm:$0xff]  }
  0xf8   : > { %748 = vst [vmem:[#allocation2 + $0x158] sm:$0xf] %v744_v57  ;;  %v743_v59 = vsel %vm742_vm14, %v736_v51, %v741_v58  ;;  %v756_v60 = vpop.permute.xlu1 %755  ;;  %v754_v61 = vpop.permute.xlu0 %753  ;;  %1865 = vmatpush1.bf16.msra.mxu0 %v2632_v56  ;;  %1285 = vperm.xlu1 %2874, %v1239_v50   ;;  %vm1012_vm14 = vcmask 736256  }
  0xf9   : > { %v758_v62 = vrot.slane %v756_v60, 4  ;;  %v757_v63 = vrot.slane %v754_v61, 4 }
  0xfb   : > { %v762_v0 = vsel %vm760_vm15, %v756_v60, %v758_v62  ;;  %v759_v1 = vsel %vm236_vm0, %v757_v63, %v758_v62  ;;  %v2885_v2 = vld [vmem:[#allocation2 + $0x140] ss:$12 sps:$4 sm:$0xff]   ;;  %v1241_v63 = vld [vmem:[%s3467_s2 + $0x50] sm:$0xff] }
  0xfc   : > { %766 = vst [vmem:[#allocation2 + $0x164] sm:$0xf] %v762_v0  ;;  %v761_v3 = vsel %vm760_vm15, %v754_v61, %v759_v1  ;;  %v774_v4 = vpop.permute.xlu1 %773  ;;  %v772_v5 = vpop.permute.xlu0 %771  ;;  %2699 = vmatprep.subr.bf16.mxu1 %v2885_v2  ;;  %v2899_v62 = vld [vmem:[%s3466_s1 + $0x20] ss:$16 sps:$4 sm:$0xff]   ;;  %1295 = vperm.xlu1 %2874, %v1241_v63   ;;  %vm1030_vm15 = vcmask 728064  }
  0xfd   : > { %v776_v7 = vrot.slane %v774_v4, 4  ;;  %v775_v8 = vrot.slane %v772_v5, 4  ;;  %v2636_v9 = vcombine.high %v743_v59, %v761_v3  ;;  %v2635_v10 = vcombine.low %v743_v59, %v761_v3  ;;  %2700 = vmatpush3.bf16.msra.mxu1 %v2886_v6  ;;  %v1240_v59 = vld [vmem:[%s3467_s2 + $0x48] sm:$0xff]  ;;  %v2901_v3 = vld [vmem:[%s3466_s1 + $0x44] ss:$16 sps:$4 sm:$0xff]   ;;  %v1242_v6 = vld [vmem:[%s3467_s2 + $0x58] sm:$0xff] }
  0xfe   : > { %1290 = vperm.xlu0 %2873, %v1240_v59  }
  0xff   : > { %v780_v13 = vsel %vm778_vm1, %v774_v4, %v776_v7  ;;  %v777_v14 = vsel %vm236_vm0, %v775_v8, %v776_v7  ;;  %1866 = vmatprep.subr.bf16.mxu0 %v2636_v9 }
 0x100   : > { %784 = vst [vmem:[#allocation2 + $0x170] sm:$0xf] %v780_v13  ;;  %v779_v16 = vsel %vm778_vm1, %v772_v5, %v777_v14  ;;  %v792_v17 = vpop.permute.xlu1 %791  ;;  %v790_v18 = vpop.permute.xlu0 %789  ;;  %1867 = vmatpush1.bf16.msra.mxu0 %v2635_v10  ;;  %v2316_v10 = vld [vmem:[%s3469_s4] sm:$0xff]  ;;  %vm1048_vm1 = vcmask 719872  }
 0x101   : > { %v794_v20 = vrot.slane %v792_v17, 4  ;;  %v793_v21 = vrot.slane %v790_v18, 4  ;;  %2322 = vperm.xlu1 %2874, %v2316_v10  }
 0x102   : > { %1300 = vperm.xlu0 %2873, %v1242_v6  }
 0x103   : > { %v798_v22 = vsel %vm796_vm2, %v792_v17, %v794_v20  ;;  %v795_v23 = vsel %vm236_vm0, %v793_v21, %v794_v20  ;;  %v2887_v24 = vld [vmem:[#allocation2 + $0x158] ss:$12 sps:$4 sm:$0xff]   ;;  %v2903_v21 = vld [vmem:[%s3466_s1 + $0x40] ss:$16 sps:$4 sm:$0xff]  }
 0x104   : > { %802 = vst [vmem:[#allocation2 + $0x17c] sm:$0xf] %v798_v22  ;;  %v797_v26 = vsel %vm796_vm2, %v790_v18, %v795_v23  ;;  %v810_v27 = vpop.permute.xlu1 %809  ;;  %v808_v28 = vpop.permute.xlu0 %807  ;;  %2701 = vmatprep.subr.bf16.mxu1 %v2887_v24  ;;  %v2317_v18 = vld [vmem:[%s3469_s4 + $0x8] sm:$0xff]  ;;  %v2318_v22 = vld [vmem:[%s3469_s4 + $0x10] sm:$0xff] }
 0x105   : > { %v812_v31 = vrot.slane %v810_v27, 4  ;;  %v811_v32 = vrot.slane %v808_v28, 4  ;;  %v2639_v33 = vcombine.high %v779_v16, %v797_v26  ;;  %v2638_v34 = vcombine.low %v779_v16, %v797_v26  ;;  %2702 = vmatpush3.bf16.msra.mxu1 %v2888_v29  ;;  %v2905_v26 = vld [vmem:[%s3466_s1 + $0x64] ss:$16 sps:$4 sm:$0xff]   ;;  %v2319_v29 = vld [vmem:[%s3469_s4 + $0x18] sm:$0xff]  ;;  %2332 = vperm.xlu1 %2874, %v2318_v22  }
 0x106   : > { %2327 = vperm.xlu0 %2873, %v2317_v18  }
 0x107   : > { %v816_v35 = vsel %vm814_vm3, %v810_v27, %v812_v31  ;;  %v813_v36 = vsel %vm236_vm0, %v811_v32, %v812_v31  ;;  %1868 = vmatprep.subr.bf16.mxu0 %v2639_v33 }
 0x108   : > { %820 = vst [vmem:[#allocation2 + $0x188] sm:$0xf] %v816_v35  ;;  %v815_v40 = vsel %vm814_vm3, %v808_v28, %v813_v36  ;;  %v828_v41 = vpop.permute.xlu1 %827  ;;  %v826_v42 = vpop.permute.xlu0 %825  ;;  %1869 = vmatpush1.bf16.msra.mxu0 %v2638_v34  ;;  %vm1066_vm3 = vcmask 711680  }
 0x109   : > { %v830_v45 = vrot.slane %v828_v41, 4  ;;  %v829_v46 = vrot.slane %v826_v42, 4 }
 0x10a   : > { %2337 = vperm.xlu0 %2873, %v2319_v29  }
 0x10b   : > { %v834_v47 = vsel %vm832_vm4, %v828_v41, %v830_v45  ;;  %v831_v48 = vsel %vm236_vm0, %v829_v46, %v830_v45  ;;  %v2889_v49 = vld [vmem:[#allocation2 + $0x170] ss:$12 sps:$4 sm:$0xff]   ;;  %1871 = vmatmul.mubr.bf16.vlgmr.msra.gmra.mrb[0].mxu0 %v2891_v37 }
 0x10c   : > { %838 = vst [vmem:[#allocation2 + $0x194] sm:$0xf] %v834_v47  ;;  %v833_v51 = vsel %vm832_vm4, %v826_v42, %v831_v48  ;;  %v846_v52 = vpop.permute.xlu1 %845  ;;  %v844_v53 = vpop.permute.xlu0 %843  ;;  %1880 = vmatprep.mubr.bf16.mxu0 %v2897_v43  ;;  %2703 = vmatprep.subr.bf16.mxu1 %v2889_v49  ;;  %v2909_v47 = vld [vmem:[%s3466_s1 + $0x84] ss:$16 sps:$4 sm:$0xff]   ;;  %vm1084_vm4 = vcmask 703488  }
 0x10d   : > { %v848_v55 = vrot.slane %v846_v52, 4  ;;  %v847_v56 = vrot.slane %v844_v53, 4  ;;  %v2641_v57 = vcombine.low %v815_v40, %v833_v51  ;;  %v2642_v58 = vcombine.high %v815_v40, %v833_v51  ;;  %2704 = vmatpush3.bf16.msra.mxu1 %v2890_v54 }
 0x10e   : > { %2105 = vmatprep.subr.bf16.mxu1 %v2979_v39 }
 0x10f   : > { %v852_v60 = vsel %vm850_vm5, %v846_v52, %v848_v55  ;;  %v849_v61 = vsel %vm236_vm0, %v847_v56, %v848_v55  ;;  %1931 = vmatprep.subr.bf16.mxu0 %v2642_v58 }
 0x110   : > { %856 = vst [vmem:[#allocation2 + $0x1a0] sm:$0xf] %v852_v60  ;;  %v851_v0 = vsel %vm850_vm5, %v844_v53, %v849_v61  ;;  %v864_v1 = vpop.permute.xlu1 %863  ;;  %v862_v2 = vpop.permute.xlu0 %861  ;;  %1932 = vmatpush1.bf16.msra.mxu0 %v2641_v57  ;;  %2057 = vmatmul.mubr.bf16.vlgmr.msra.gmra.mrb[0].mxu1 %v2891_v37  ;;  %vm1102_vm5 = vcmask 695296  }
 0x111   : > { %v866_v4 = vrot.slane %v864_v1, 4  ;;  %v865_v5 = vrot.slane %v862_v2, 4  ;;  %2064 = vmatprep.mubr.bf16.mxu1 %v2897_v43  ;;  %v2907_v43 = vld [vmem:[%s3466_s1 + $0x60] ss:$16 sps:$4 sm:$0xff]  }
 0x113   : > { %v870_v7 = vsel %vm868_vm6, %v864_v1, %v866_v4  ;;  %v867_v8 = vsel %vm236_vm0, %v865_v5, %v866_v4  ;;  %v2894_v9 = vld [vmem:[#allocation2 + $0x188] ss:$12 sps:$4 sm:$0xff]   ;;  %1881 = vmatmul.mubr.bf16.gmra.mrb[4].mxu0 %v2899_v62 }
 0x114   : > { %874 = vst [vmem:[#allocation2 + $0x1ac] sm:$0xf] %v870_v7  ;;  %v869_v11 = vsel %vm868_vm6, %v862_v2, %v867_v8  ;;  %v882_v12 = vpop.permute.xlu1 %881  ;;  %v880_v13 = vpop.permute.xlu0 %879  ;;  %1890 = vmatprep.mubr.bf16.mxu0 %v2901_v3  ;;  %2106 = vmatpush1.bf16.msra.mxu1 %v2894_v9  ;;  %v2913_v2 = vld [vmem:[%s3466_s1 + $0xa4] ss:$16 sps:$4 sm:$0xff]  }
 0x115   : > { %v884_v14 = vrot.slane %v882_v12, 4  ;;  %v883_v15 = vrot.slane %v880_v13, 4  ;;  %v2644_v16 = vcombine.low %v851_v0, %v869_v11  ;;  %v2645_v17 = vcombine.high %v851_v0, %v869_v11  ;;  %2107 = vmatprep.subr.bf16.mxu1 %v2979_v39 }
 0x117   : > { %v888_v19 = vsel %vm886_vm7, %v882_v12, %v884_v14  ;;  %v885_v20 = vsel %vm236_vm0, %v883_v15, %v884_v14  ;;  %1933 = vmatprep.subr.bf16.mxu0 %v2645_v17  ;;  %v2915_v17 = vld [vmem:[%s3466_s1 + $0xa0] ss:$16 sps:$4 sm:$0xff]  }
 0x118   : > { %892 = vst [vmem:[#allocation2 + $0x1b8] sm:$0xf] %v888_v19  ;;  %v887_v23 = vsel %vm886_vm7, %v880_v13, %v885_v20  ;;  %v900_v24 = vpop.permute.xlu1 %899  ;;  %v898_v25 = vpop.permute.xlu0 %897  ;;  %1934 = vmatpush1.bf16.msra.mxu0 %v2644_v16  ;;  %2065 = vmatmul.mubr.bf16.gmra.mrb[4].mxu1 %v2899_v62  ;;  %v2911_v62 = vld [vmem:[%s3466_s1 + $0x80] ss:$16 sps:$4 sm:$0xff]  }
 0x119   : > { %v902_v27 = vrot.slane %v900_v24, 4  ;;  %v901_v28 = vrot.slane %v898_v25, 4  ;;  %2072 = vmatprep.mubr.bf16.mxu1 %v2901_v3 }
 0x11b   : > { %v906_v30 = vsel %vm904_vm8, %v900_v24, %v902_v27  ;;  %v903_v31 = vsel %vm236_vm0, %v901_v28, %v902_v27  ;;  %v2895_v32 = vld [vmem:[#allocation2 + $0x1a0] ss:$12 sps:$4 sm:$0xff]   ;;  %1891 = vmatmul.mubr.bf16.gmra.mrb[8].mxu0 %v2903_v21 }
 0x11c   : > { %910 = vst [vmem:[#allocation2 + $0x1c4] sm:$0xf] %v906_v30  ;;  %v905_v33 = vsel %vm904_vm8, %v898_v25, %v903_v31  ;;  %v918_v34 = vpop.permute.xlu1 %917  ;;  %v916_v35 = vpop.permute.xlu0 %915  ;;  %1900 = vmatprep.mubr.bf16.mxu0 %v2905_v26  ;;  %2108 = vmatpush1.bf16.msra.mxu1 %v2895_v32 }
 0x11d   : > { %v920_v36 = vrot.slane %v918_v34, 4  ;;  %v919_v37 = vrot.slane %v916_v35, 4  ;;  %v2647_v38 = vcombine.low %v887_v23, %v905_v33  ;;  %v2648_v40 = vcombine.high %v887_v23, %v905_v33  ;;  %2109 = vmatprep.subr.bf16.mxu1 %v2979_v39 }
 0x11f   : > { %v924_v41 = vsel %vm922_vm9, %v918_v34, %v920_v36  ;;  %v921_v42 = vsel %vm236_vm0, %v919_v37, %v920_v36  ;;  %1935 = vmatprep.subr.bf16.mxu0 %v2648_v40 }
 0x120   : > { %928 = vst [vmem:[#allocation2 + $0x1d0] sm:$0xf] %v924_v41  ;;  %v923_v44 = vsel %vm922_vm9, %v916_v35, %v921_v42  ;;  %v936_v45 = vpop.permute.xlu1 %935  ;;  %v934_v46 = vpop.permute.xlu0 %933  ;;  %1936 = vmatpush1.bf16.msra.mxu0 %v2647_v38  ;;  %2073 = vmatmul.mubr.bf16.gmra.mrb[8].mxu1 %v2903_v21  ;;  %v2920_v21 = vld [vmem:[%s3466_s1 + $0xc] ss:$16 sps:$4 sm:$0xff]  }
 0x121   : > { %v938_v48 = vrot.slane %v936_v45, 4  ;;  %v937_v49 = vrot.slane %v934_v46, 4  ;;  %2080 = vmatprep.mubr.bf16.mxu1 %v2905_v26 }
 0x123   : > { %v942_v50 = vsel %vm940_vm10, %v936_v45, %v938_v48  ;;  %v939_v51 = vsel %vm236_vm0, %v937_v49, %v938_v48  ;;  %v2896_v52 = vld [vmem:[#allocation2 + $0x1b8] ss:$12 sps:$4 sm:$0xff]   ;;  %1901 = vmatmul.mubr.bf16.gmra.mrb[12].mxu0 %v2907_v43 }
 0x124   : > { %946 = vst [vmem:[#allocation2 + $0x1dc] sm:$0xf] %v942_v50  ;;  %v941_v53 = vsel %vm940_vm10, %v934_v46, %v939_v51  ;;  %v954_v54 = vpop.permute.xlu1 %953  ;;  %v952_v55 = vpop.permute.xlu0 %951  ;;  %1910 = vmatprep.mubr.bf16.mxu0 %v2909_v47  ;;  %2110 = vmatpush1.bf16.msra.mxu1 %v2896_v52 }
 0x125   : > { %v956_v56 = vrot.slane %v954_v54, 4  ;;  %v955_v57 = vrot.slane %v952_v55, 4  ;;  %v2650_v58 = vcombine.low %v923_v44, %v941_v53  ;;  %v2651_v59 = vcombine.high %v923_v44, %v941_v53  ;;  %2111 = vmatprep.subr.bf16.mxu1 %v2979_v39 }
 0x127   : > { %v960_v60 = vsel %vm958_vm11, %v954_v54, %v956_v56  ;;  %v957_v61 = vsel %vm236_vm0, %v955_v57, %v956_v56  ;;  %1937 = vmatprep.subr.bf16.mxu0 %v2651_v59 }
 0x128   : > { %964 = vst [vmem:[#allocation2 + $0x1e8] sm:$0xf] %v960_v60  ;;  %v959_v63 = vsel %vm958_vm11, %v952_v55, %v957_v61  ;;  %v972_v0 = vpop.permute.xlu1 %971  ;;  %v970_v1 = vpop.permute.xlu0 %969  ;;  %1938 = vmatpush1.bf16.msra.mxu0 %v2650_v58  ;;  %2081 = vmatmul.mubr.bf16.gmra.mrb[12].mxu1 %v2907_v43 }
 0x129   : > { %v974_v3 = vrot.slane %v972_v0, 4  ;;  %v973_v4 = vrot.slane %v970_v1, 4  ;;  %2088 = vmatprep.mubr.bf16.mxu1 %v2909_v47 }
 0x12b   : > { %v978_v5 = vsel %vm976_vm12, %v972_v0, %v974_v3  ;;  %v975_v6 = vsel %vm236_vm0, %v973_v4, %v974_v3  ;;  %v2900_v7 = vld [vmem:[#allocation2 + $0x1d0] ss:$12 sps:$4 sm:$0xff]   ;;  %1911 = vmatmul.mubr.bf16.gmra.mrb[16].mxu0 %v2911_v62 }
 0x12c   : > { %982 = vst [vmem:[#allocation2 + $0x1f4] sm:$0xf] %v978_v5  ;;  %v977_v8 = vsel %vm976_vm12, %v970_v1, %v975_v6  ;;  %v990_v9 = vpop.permute.xlu1 %989  ;;  %v988_v10 = vpop.permute.xlu0 %987  ;;  %1920 = vmatprep.mubr.bf16.mxu0 %v2913_v2  ;;  %2112 = vmatpush1.bf16.msra.mxu1 %v2900_v7 }
 0x12d   : > { %v992_v11 = vrot.slane %v990_v9, 4  ;;  %v991_v12 = vrot.slane %v988_v10, 4  ;;  %v2653_v13 = vcombine.low %v959_v63, %v977_v8  ;;  %v2654_v14 = vcombine.high %v959_v63, %v977_v8  ;;  %2113 = vmatprep.subr.bf16.mxu1 %v2979_v39 }
 0x12f   : > { %v996_v15 = vsel %vm994_vm13, %v990_v9, %v992_v11  ;;  %v993_v16 = vsel %vm236_vm0, %v991_v12, %v992_v11  ;;  %1939 = vmatprep.subr.bf16.mxu0 %v2654_v14 }
 0x130   : > { %1000 = vst [vmem:[#allocation2 + $0x200] sm:$0xf] %v996_v15  ;;  %v995_v18 = vsel %vm994_vm13, %v988_v10, %v993_v16  ;;  %v1008_v19 = vpop.permute.xlu1 %1007  ;;  %v1006_v20 = vpop.permute.xlu0 %1005  ;;  %1940 = vmatpush1.bf16.msra.mxu0 %v2653_v13  ;;  %2089 = vmatmul.mubr.bf16.gmra.mrb[16].mxu1 %v2911_v62  ;;  %v2918_v10 = vld [vmem:[%s3466_s1 + $0x8] ss:$16 sps:$4 sm:$0xff]   ;;  %v2921_v13 = vld [vmem:[%s3466_s1 + $0x2c] ss:$16 sps:$4 sm:$0xff]  }
 0x131   : > { %v1010_v22 = vrot.slane %v1008_v19, 4  ;;  %v1009_v23 = vrot.slane %v1006_v20, 4  ;;  %2096 = vmatprep.mubr.bf16.mxu1 %v2913_v2  ;;  %v2923_v16 = vld [vmem:[%s3466_s1 + $0x28] ss:$16 sps:$4 sm:$0xff]  }
 0x133   : > { %v1014_v24 = vsel %vm1012_vm14, %v1008_v19, %v1010_v22  ;;  %v1011_v25 = vsel %vm236_vm0, %v1009_v23, %v1010_v22  ;;  %v2904_v26 = vld [vmem:[#allocation2 + $0x1e8] ss:$12 sps:$4 sm:$0xff]   ;;  %1921 = vmatmul.mubr.bf16.gmra.mrb[20].mxu0 %v2915_v17  ;;  %v2927_v19 = vld [vmem:[%s3466_s1 + $0x6c] ss:$16 sps:$4 sm:$0xff]  }
 0x134   : > { %1018 = vst [vmem:[#allocation2 + $0x20c] sm:$0xf] %v1014_v24  ;;  %v1013_v27 = vsel %vm1012_vm14, %v1006_v20, %v1011_v25  ;;  %v1026_v28 = vpop.permute.xlu1 %1025  ;;  %v1024_v29 = vpop.permute.xlu0 %1023  ;;  %2669 = vmatprep.mubr.msk.bf16.mxu0 %vm796_vm2, %v2920_v21  ;;  %2114 = vmatpush1.bf16.msra.mxu1 %v2904_v26  ;;  %v2929_v20 = vld [vmem:[%s3466_s1 + $0x68] ss:$16 sps:$4 sm:$0xff]   ;;  %v2933_v23 = vld [vmem:[%s3466_s1 + $0xac] ss:$16 sps:$4 sm:$0xff]  }
 0x135   : > { %v1028_v30 = vrot.slane %v1026_v28, 4  ;;  %v1027_v31 = vrot.slane %v1024_v29, 4  ;;  %v2656_v32 = vcombine.low %v995_v18, %v1013_v27  ;;  %v2657_v33 = vcombine.high %v995_v18, %v1013_v27  ;;  %2115 = vmatprep.subr.bf16.mxu1 %v2979_v39  ;;  %v2926_v18 = vld [vmem:[%s3466_s1 + $0x48] ss:$16 sps:$4 sm:$0xff]  }
 0x136   : > { %v2932_v22 = vld [vmem:[%s3466_s1 + $0x88] ss:$16 sps:$4 sm:$0xff]  }
 0x137   : > { %v1032_v34 = vsel %vm1030_vm15, %v1026_v28, %v1028_v30  ;;  %v1029_v35 = vsel %vm236_vm0, %v1027_v31, %v1028_v30  ;;  %1941 = vmatprep.subr.bf16.mxu0 %v2657_v33  ;;  %v2935_v24 = vld [vmem:[%s3466_s1 + $0xa8] ss:$16 sps:$4 sm:$0xff]  }
 0x138   : > { %1036 = vst [vmem:[#allocation2 + $0x218] sm:$0xf] %v1032_v34  ;;  %v1031_v36 = vsel %vm1030_vm15, %v1024_v29, %v1029_v35  ;;  %v1044_v37 = vpop.permute.xlu1 %1043  ;;  %v1042_v38 = vpop.permute.xlu0 %1041  ;;  %1942 = vmatpush1.bf16.msra.mxu0 %v2656_v32  ;;  %2097 = vmatmul.mubr.bf16.gmra.mrb[20].mxu1 %v2915_v17  ;;  %v2924_v17 = vld [vmem:[%s3466_s1 + $0x4c] ss:$16 sps:$4 sm:$0xff]  }
 0x139   : > { %v1046_v40 = vrot.slane %v1044_v37, 4  ;;  %v1045_v41 = vrot.slane %v1042_v38, 4  ;;  %2675 = vmatprep.mubr.msk.bf16.mxu1 %vm796_vm2, %v2920_v21  ;;  %v2930_v21 = vld [vmem:[%s3466_s1 + $0x8c] ss:$16 sps:$4 sm:$0xff]  }
 0x13b   : > { %v1050_v42 = vsel %vm1048_vm1, %v1044_v37, %v1046_v40  ;;  %v1047_v43 = vsel %vm236_vm0, %v1045_v41, %v1046_v40  ;;  %v2908_v44 = vld [vmem:[#allocation2 + $0x200] ss:$12 sps:$4 sm:$0xff]  }
 0x13c   : > { %1054 = vst [vmem:[#allocation2 + $0x224] sm:$0xf] %v1050_v42  ;;  %v1049_v45 = vsel %vm1048_vm1, %v1042_v38, %v1047_v43  ;;  %v1062_v46 = vpop.permute.xlu1 %1061  ;;  %v1060_v47 = vpop.permute.xlu0 %1059  ;;  %2116 = vmatpush1.bf16.msra.mxu1 %v2908_v44 }
 0x13d   : > { %v1064_v48 = vrot.slane %v1062_v46, 4  ;;  %v1063_v49 = vrot.slane %v1060_v47, 4  ;;  %v2659_v50 = vcombine.low %v1031_v36, %v1049_v45  ;;  %v2660_v51 = vcombine.high %v1031_v36, %v1049_v45  ;;  %2117 = vmatprep.subr.bf16.mxu1 %v2979_v39 }
 0x13f   : > { %v1068_v52 = vsel %vm1066_vm3, %v1062_v46, %v1064_v48  ;;  %v1065_v53 = vsel %vm236_vm0, %v1063_v49, %v1064_v48  ;;  %1943 = vmatprep.subr.bf16.mxu0 %v2660_v51 }
 0x140   : > { %1072 = vst [vmem:[#allocation2 + $0x230] sm:$0xf] %v1068_v52  ;;  %v1067_v54 = vsel %vm1066_vm3, %v1060_v47, %v1065_v53  ;;  %v1080_v55 = vpop.permute.xlu1 %1079  ;;  %v1078_v56 = vpop.permute.xlu0 %1077  ;;  %1944 = vmatpush1.bf16.msra.mxu0 %v2659_v50 }
 0x141   : > { %v1082_v57 = vrot.slane %v1080_v55, 4  ;;  %v1081_v58 = vrot.slane %v1078_v56, 4 }
 0x143   : > { %v1086_v59 = vsel %vm1084_vm4, %v1080_v55, %v1082_v57  ;;  %v1083_v60 = vsel %vm236_vm0, %v1081_v58, %v1082_v57  ;;  %v2912_v61 = vld [vmem:[#allocation2 + $0x218] ss:$12 sps:$4 sm:$0xff]  }
 0x144   : > { %1090 = vst [vmem:[#allocation2 + $0x23c] sm:$0xf] %v1086_v59  ;;  %v1085_v62 = vsel %vm1084_vm4, %v1078_v56, %v1083_v60  ;;  %v1098_v63 = vpop.permute.xlu1 %1097  ;;  %v1096_v0 = vpop.permute.xlu0 %1095  ;;  %2118 = vmatpush1.bf16.msra.mxu1 %v2912_v61 }
 0x145   : > { %v1100_v1 = vrot.slane %v1098_v63, 4  ;;  %v1099_v2 = vrot.slane %v1096_v0, 4  ;;  %v2662_v3 = vcombine.low %v1067_v54, %v1085_v62  ;;  %v2663_v4 = vcombine.high %v1067_v54, %v1085_v62  ;;  %2119 = vmatprep.subr.bf16.mxu1 %v2979_v39 }
 0x147   : > { %v1104_v5 = vsel %vm1102_vm5, %v1098_v63, %v1100_v1  ;;  %v1101_v6 = vsel %vm236_vm0, %v1099_v2, %v1100_v1  ;;  %1945 = vmatprep.subr.bf16.mxu0 %v2663_v4 }
 0x148   : > { %1108 = vst [vmem:[#allocation2 + $0x248] sm:$0xf] %v1104_v5  ;;  %v1103_v7 = vsel %vm1102_vm5, %v1096_v0, %v1101_v6  ;;  %1946 = vmatpush1.bf16.msra.mxu0 %v2662_v3 }
 0x149   : > { %v2666_v8 = vcombine.high %v1103_v7, %v1103_v7  ;;  %v2665_v9 = vcombine.low %v1103_v7, %v1103_v7 }
 0x14b   : > { %v2916_v11 = vld [vmem:[#allocation2 + $0x230] ss:$12 sps:$4 sm:$0xff]   ;;  %2668 = vmatprep.subr.msk.bf16.mxu0 %vm236_vm0, %v2666_v8  ;;  %v1830_v12 = vsel %vm236_vm0, %v2665_v9, 0 }
 0x14c   : > { %1948 = vmatpush1.bf16.msra.mxu0 %v1830_v12  ;;  %2120 = vmatpush1.bf16.msra.mxu1 %v2916_v11 }
 0x14d   : > { %2121 = vmatprep.subr.bf16.mxu1 %v2979_v39 }
 0x14f   : > { %v2917_v14 = vld [vmem:[#allocation2 + $0x248] ss:$0 sps:$4 sm:$0xff]   ;;  %1964 = vmatmul.mubr.bf16.vlgmr.msra.gmra.mrb[0].mxu0 %v2918_v10 }
 0x150   : > { %2670 = vmatprep.mubr.msk.bf16.mxu0 %vm796_vm2, %v2921_v13  ;;  %v1836_v15 = vsel %vm236_vm0, %v2917_v14, 0 }
 0x151   : > { %2122 = vmatpush1.bf16.msra.mxu1 %v1836_v15 }
 0x154   : > { %2138 = vmatmul.mubr.bf16.vlgmr.msra.gmra.mrb[24].mxu1 %v2918_v10 }
 0x155   : > { %2676 = vmatprep.mubr.msk.bf16.mxu1 %vm796_vm2, %v2921_v13 }
 0x157   : > { %1974 = vmatmul.mubr.bf16.gmra.mrb[4].mxu0 %v2923_v16 }
 0x158   : > { %2671 = vmatprep.mubr.msk.bf16.mxu0 %vm796_vm2, %v2924_v17 }
 0x15c   : > { %2146 = vmatmul.mubr.bf16.gmra.mrb[28].mxu1 %v2923_v16 }
 0x15d   : > { %2677 = vmatprep.mubr.msk.bf16.mxu1 %vm796_vm2, %v2924_v17 }
 0x15f   : > { %1984 = vmatmul.mubr.bf16.gmra.mrb[8].mxu0 %v2926_v18 }
 0x160   : > { %2672 = vmatprep.mubr.msk.bf16.mxu0 %vm796_vm2, %v2927_v19 }
 0x164   : > { %2154 = vmatmul.mubr.bf16.gmra.mrb[32].mxu1 %v2926_v18 }
 0x165   : > { %2678 = vmatprep.mubr.msk.bf16.mxu1 %vm796_vm2, %v2927_v19  ;;  %v1246_v62 = vpop.permute.xlu0 %1245  ;;  %v1251_v2 = vpop.permute.xlu1 %1250 }
 0x167   : > { %1994 = vmatmul.mubr.bf16.gmra.mrb[12].mxu0 %v2929_v20 }
 0x168   : > { %2673 = vmatprep.mubr.msk.bf16.mxu0 %vm796_vm2, %v2930_v21 }
 0x169   : > { %v1256_v14 = vpop.permute.xlu1 %1255 }
 0x16c   : > { %2162 = vmatmul.mubr.bf16.gmra.mrb[36].mxu1 %v2929_v20 }
 0x16d   : > { %2679 = vmatprep.mubr.msk.bf16.mxu1 %vm796_vm2, %v2930_v21 }
 0x16f   : > { %2004 = vmatmul.mubr.bf16.gmra.mrb[16].mxu0 %v2932_v22 }
 0x170   : > { %2674 = vmatprep.mubr.msk.bf16.mxu0 %vm796_vm2, %v2933_v23 }
 0x174   : > { %2170 = vmatmul.mubr.bf16.gmra.mrb[40].mxu1 %v2932_v22 }
 0x175   : > { %2680 = vmatprep.mubr.msk.bf16.mxu1 %vm796_vm2, %v2933_v23 }
 0x177   : > { %2014 = vmatmul.mubr.bf16.gmra.mrb[20].mxu0 %v2935_v24 }
 0x17c   : > { %2178 = vmatmul.mubr.bf16.gmra.mrb[44].mxu1 %v2935_v24 }
 0x17d   : > { %2389 = vmatprep.mubr.bf16.mxu1 %v2979_v39 }
 0x1e3   : > { %v2705_v25 = vpop.f32.mrb[0].mxu1 }
 0x1e4   : > { %v2706_v26 = vpop.f32.mrb[1].mxu1 }
 0x1e5   : > { %v2707_v27 = vadd.f32 %v2706_v26, %v2705_v25  ;;  %v2708_v28 = vpop.f32.mrb[2].mxu1 }
 0x1e6   : > { %v2709_v29 = vpop.f32.mrb[3].mxu1 }
 0x1e7   : > { %v2710_v30 = vadd.f32 %v2709_v29, %v2708_v28  ;;  %v2059_v9 = vadd.f32 %v2707_v27, %v1246_v62 }
 0x1e9   : > { %v2062_v18 = vadd.f32 %v2710_v30, %v1251_v2 }
 0x1eb   : > { %v2711_v31 = vpop.f32.mrb[4].mxu1 }
 0x1ec   : > { %v2712_v32 = vpop.f32.mrb[5].mxu1 }
 0x1ed   : > { %v3370_v33 = vadd.f32 %v2712_v32, %v2711_v31  ;;  %v2714_v34 = vpop.f32.mrb[6].mxu1 }
 0x1ee   : > { %v2715_v35 = vpop.f32.mrb[7].mxu1 }
 0x1ef   : > { %v3372_v36 = vadd.f32 %v2715_v35, %v2714_v34  ;;  %v1261_v35 = vpop.permute.xlu0 %1260  ;;  %v2067_v30 = vadd.f32 %v3370_v33, %v1256_v14 }
 0x1f3   : > { %v2717_v37 = vpop.f32.mrb[8].mxu1 }
 0x1f4   : > { %v2718_v38 = vpop.f32.mrb[9].mxu1 }
 0x1f5   : > { %v3374_v40 = vadd.f32 %v2718_v38, %v2717_v37  ;;  %v2720_v41 = vpop.f32.mrb[10].mxu1 }
 0x1f6   : > { %v2721_v42 = vpop.f32.mrb[11].mxu1 }
 0x1f7   : > { %v3376_v43 = vadd.f32 %v2721_v42, %v2720_v41 }
 0x1fb   : > { %v2723_v44 = vpop.f32.mrb[12].mxu1 }
 0x1fc   : > { %v2724_v45 = vpop.f32.mrb[13].mxu1 }
 0x1fd   : > { %v3378_v46 = vadd.f32 %v2724_v45, %v2723_v44  ;;  %v2726_v47 = vpop.f32.mrb[14].mxu1 }
 0x1fe   : > { %v2727_v48 = vpop.f32.mrb[15].mxu1 }
 0x1ff   : > { %v3380_v49 = vadd.f32 %v2727_v48, %v2726_v47 }
 0x203   : > { %v2729_v50 = vpop.f32.mrb[16].mxu1 }
 0x204   : > { %v2730_v51 = vpop.f32.mrb[17].mxu1 }
 0x205   : > { %v3382_v52 = vadd.f32 %v2730_v51, %v2729_v50  ;;  %v2732_v53 = vpop.f32.mrb[18].mxu1 }
 0x206   : > { %v2733_v54 = vpop.f32.mrb[19].mxu1 }
 0x207   : > { %v3384_v55 = vadd.f32 %v2733_v54, %v2732_v53  ;;  %v1266_v54 = vpop.permute.xlu1 %1265 }
 0x20b   : > { %v2735_v56 = vpop.f32.mrb[20].mxu1 }
 0x20c   : > { %v2736_v57 = vpop.f32.mrb[21].mxu1 }
 0x20d   : > { %v3386_v58 = vadd.f32 %v2736_v57, %v2735_v56  ;;  %v2738_v59 = vpop.f32.mrb[22].mxu1  ;;  %v2070_v57 = vadd.f32 %v3372_v36, %v1261_v35 }
 0x20e   : > { %v2739_v60 = vpop.f32.mrb[23].mxu1 }
 0x20f   : > { %v3388_v61 = vadd.f32 %v2739_v60, %v2738_v59 }
 0x222   : > { %v1965_v63 = vpop.f32.mrb[0].mxu0 }
 0x223   : > { %v2765_v0 = vadd.f32 %v1965_v63, %v1246_v62  ;;  %v1967_v1 = vpop.f32.mrb[1].mxu0 }
 0x224   : > { %v2766_v3 = vadd.f32 %v1967_v1, %v1246_v62  ;;  %v1969_v4 = vpop.f32.mrb[2].mxu0 }
 0x225   : > { %v2222_v5 = vmul.f32 0.2, %v2765_v0  ;;  %v2767_v6 = vadd.f32 %v1969_v4, %v1251_v2  ;;  %v1971_v7 = vpop.f32.mrb[3].mxu0  ;;  %vm2186_vm0 = vcmp.gt.f32.partialorder %v2765_v0, 0.0 }
 0x226   : > { %v2768_v8 = vadd.f32 %v1971_v7, %v1251_v2  ;;  %v2223_v10 = vmul.f32 0.2, %v2766_v3  ;;  %vm2187_vm6 = vcmp.gt.f32.partialorder %v2766_v3, 0.0 }
 0x227   : > { %vm2189_vm2 = vcmp.gt.f32.partialorder %v2767_v6, 0.0  ;;  %v2225_v11 = vmul.f32 0.2, %v2767_v6  ;;  %v2139_v12 = vpop.f32.mrb[24].mxu1  ;;  %v2258_v16 = vsel %vm2186_vm0, %v2765_v0, %v2222_v5 }
 0x228   : > { %vm2190_vm7 = vcmp.gt.f32.partialorder %v2768_v8, 0.0  ;;  %v2226_v13 = vmul.f32 0.2, %v2768_v8  ;;  %v2140_v15 = vadd.f32 %v2139_v12, %v2059_v9  ;;  %v2141_v17 = vpop.f32.mrb[25].mxu1  ;;  %v2259_v29 = vsel %vm2187_vm6, %v2766_v3, %v2223_v10 }
 0x229   : > { %v2261_v19 = vsel %vm2189_vm2, %v2767_v6, %v2225_v11  ;;  %v2142_v20 = vpop.f32.mrb[26].mxu1  ;;  %v1271_v6 = vpop.permute.xlu0 %1270 }
 0x22a   : > { %v2294_v21 = vpack.c.bf16 %v2261_v19, %v2258_v16  ;;  %v1975_v22 = vpop.f32.mrb[4].mxu0  ;;  %v2262_v23 = vsel %vm2190_vm7, %v2768_v8, %v2226_v13  ;;  %v2224_v24 = vmul.f32 0.2, %v2140_v15  ;;  %v2143_v25 = vadd.f32 %v2142_v20, %v2062_v18  ;;  %v2144_v26 = vpop.f32.mrb[27].mxu1 }
 0x22b   : > { %v2769_v27 = vadd.f32 %v1975_v22, %v1256_v14  ;;  %v1977_v28 = vpop.f32.mrb[5].mxu0  ;;  %vm2188_vm8 = vcmp.gt.f32.partialorder %v2140_v15, 0.0  ;;  %v2295_v34 = vpack.c.bf16 %v2262_v23, %v2259_v29  ;;  %v2078_v17 = vadd.f32 %v3376_v43, %v1271_v6 }
 0x22c   : > { %v2770_v31 = vadd.f32 %v1977_v28, %v1256_v14  ;;  %v1979_v32 = vpop.f32.mrb[6].mxu0  ;;  %vm2191_vm9 = vcmp.gt.f32.partialorder %v2143_v25, 0.0  ;;  %v2227_v37 = vmul.f32 0.2, %v2143_v25  ;;  %v2260_v47 = vsel %vm2188_vm8, %v2140_v15, %v2224_v24 }
 0x22d   : > { %vm2192_vm10 = vcmp.gt.f32.partialorder %v2769_v27, 0.0  ;;  %v2228_v38 = vmul.f32 0.2, %v2769_v27  ;;  %v2771_v41 = vadd.f32 %v1979_v32, %v1261_v35  ;;  %v1981_v42 = vpop.f32.mrb[7].mxu0  ;;  %2357 = vmatprep.subr.bf16.mxu1 %v2295_v34  ;;  %v2075_v15 = vadd.f32 %v3374_v40, %v1266_v54 }
 0x22e   : > { %v2229_v44 = vmul.f32 0.2, %v2770_v31  ;;  %v2772_v45 = vadd.f32 %v1981_v42, %v1261_v35  ;;  %2358 = vmatpush1.bf16.msra.mxu1 %v2294_v21  ;;  %v2263_v48 = vsel %vm2191_vm9, %v2143_v25, %v2227_v37  ;;  %vm2193_vm11 = vcmp.gt.f32.partialorder %v2770_v31, 0.0  ;;  %v1276_v25 = vpop.permute.xlu1 %1275 }
 0x22f   : > { %v2147_v50 = vpop.f32.mrb[28].mxu1  ;;  %vm2195_vm12 = vcmp.gt.f32.partialorder %v2771_v41, 0.0  ;;  %v2231_v51 = vmul.f32 0.2, %v2771_v41  ;;  %v3393_v53 = vpack.c.bf16 %v2263_v48, %v2260_v47  ;;  %v2264_v60 = vsel %vm2192_vm10, %v2769_v27, %v2228_v38 }
 0x230   : > { %v2148_v56 = vadd.f32 %v2147_v50, %v2067_v30  ;;  %v2149_v33 = vpop.f32.mrb[29].mxu1  ;;  %vm2196_vm13 = vcmp.gt.f32.partialorder %v2772_v45, 0.0  ;;  %v2232_v59 = vmul.f32 0.2, %v2772_v45  ;;  %v2265_v5 = vsel %vm2193_vm11, %v2770_v31, %v2229_v44 }
 0x231   : > { %v2150_v62 = vpop.f32.mrb[30].mxu1  ;;  %v2267_v63 = vsel %vm2195_vm12, %v2771_v41, %v2231_v51  ;;  %v2083_v48 = vadd.f32 %v3378_v46, %v1276_v25 }
 0x232   : > { %v1985_v0 = vpop.f32.mrb[8].mxu0  ;;  %vm2194_vm14 = vcmp.gt.f32.partialorder %v2148_v56, 0.0  ;;  %v2151_v1 = vadd.f32 %v2150_v62, %v2070_v57  ;;  %v2297_v2 = vpack.c.bf16 %v2267_v63, %v2264_v60  ;;  %v2152_v3 = vpop.f32.mrb[31].mxu1  ;;  %v2230_v7 = vmul.f32 0.2, %v2148_v56 }
 0x233   : > { %v1987_v4 = vpop.f32.mrb[9].mxu0  ;;  %v2773_v8 = vadd.f32 %v1985_v0, %v1266_v54  ;;  %v2268_v36 = vsel %vm2196_vm13, %v2772_v45, %v2232_v59  ;;  %v1281_v45 = vpop.permute.xlu0 %1280 }
 0x234   : > { %v2774_v9 = vadd.f32 %v1987_v4, %v1266_v54  ;;  %v1989_v10 = vpop.f32.mrb[10].mxu0  ;;  %vm2197_vm15 = vcmp.gt.f32.partialorder %v2151_v1, 0.0  ;;  %v2233_v11 = vmul.f32 0.2, %v2151_v1  ;;  %v2298_v14 = vpack.c.bf16 %v2268_v36, %v2265_v5  ;;  %v1286_v46 = vpop.permute.xlu1 %1285 }
 0x235   : > { %v2775_v12 = vadd.f32 %v1989_v10, %v1271_v6  ;;  %v1991_v13 = vpop.f32.mrb[11].mxu0  ;;  %vm2198_vm1 = vcmp.gt.f32.partialorder %v2773_v8, 0.0  ;;  %v2234_v16 = vmul.f32 0.2, %v2773_v8  ;;  %v2266_v23 = vsel %vm2194_vm14, %v2148_v56, %v2230_v7 }
 0x236   : > { %v2776_v19 = vadd.f32 %v1991_v13, %v1271_v6  ;;  %2359 = vmatprep.subr.bf16.mxu1 %v2298_v14  ;;  %v2235_v22 = vmul.f32 0.2, %v2774_v9  ;;  %v2269_v24 = vsel %vm2197_vm15, %v2151_v1, %v2233_v11  ;;  %vm2199_vm5 = vcmp.gt.f32.partialorder %v2774_v9, 0.0 }
 0x237   : > { %vm2201_vm3 = vcmp.gt.f32.partialorder %v2775_v12, 0.0  ;;  %v2237_v18 = vmul.f32 0.2, %v2775_v12  ;;  %v2155_v20 = vpop.f32.mrb[32].mxu1  ;;  %v2270_v21 = vsel %vm2198_vm1, %v2773_v8, %v2234_v16  ;;  %2360 = vmatpush1.bf16.msra.mxu1 %v2297_v2  ;;  %v3403_v32 = vpack.c.bf16 %v2269_v24, %v2266_v23  ;;  %v1291_v14 = vpop.permute.xlu0 %1290 }
 0x238   : > { %v2156_v26 = vadd.f32 %v2155_v20, %v2075_v15  ;;  %v2157_v27 = vpop.f32.mrb[33].mxu1  ;;  %vm2202_vm4 = vcmp.gt.f32.partialorder %v2776_v19, 0.0  ;;  %v2238_v28 = vmul.f32 0.2, %v2776_v19  ;;  %v2271_v50 = vsel %vm2199_vm5, %v2774_v9, %v2235_v22 }
 0x239   : > { %v2273_v40 = vsel %vm2201_vm3, %v2775_v12, %v2237_v18  ;;  %v2158_v43 = vpop.f32.mrb[34].mxu1  ;;  %v2086_v4 = vadd.f32 %v3380_v49, %v1281_v45  ;;  %v2091_v23 = vadd.f32 %v3382_v52, %v1286_v46 }
 0x23a   : > { %v2300_v29 = vpack.c.bf16 %v2273_v40, %v2270_v21  ;;  %v1995_v31 = vpop.f32.mrb[12].mxu0  ;;  %v2236_v34 = vmul.f32 0.2, %v2156_v26  ;;  %v2159_v35 = vadd.f32 %v2158_v43, %v2078_v17  ;;  %v2160_v37 = vpop.f32.mrb[35].mxu1  ;;  %vm2200_vm0 = vcmp.gt.f32.partialorder %v2156_v26, 0.0 }
 0x23b   : > { %v2777_v30 = vadd.f32 %v1995_v31, %v1276_v25  ;;  %v1997_v38 = vpop.f32.mrb[13].mxu0  ;;  %v2274_v44 = vsel %vm2202_vm4, %v2776_v19, %v2238_v28 }
 0x23c   : > { %v2778_v41 = vadd.f32 %v1997_v38, %v1276_v25  ;;  %v1999_v42 = vpop.f32.mrb[14].mxu0  ;;  %vm2203_vm2 = vcmp.gt.f32.partialorder %v2159_v35, 0.0  ;;  %v2239_v47 = vmul.f32 0.2, %v2159_v35  ;;  %v2301_v33 = vpack.c.bf16 %v2274_v44, %v2271_v50 }
 0x23d   : > { %vm2204_vm6 = vcmp.gt.f32.partialorder %v2777_v30, 0.0  ;;  %v2240_v51 = vmul.f32 0.2, %v2777_v30  ;;  %v2779_v54 = vadd.f32 %v1999_v42, %v1281_v45  ;;  %v2001_v56 = vpop.f32.mrb[15].mxu0  ;;  %v2272_v60 = vsel %vm2200_vm0, %v2156_v26, %v2236_v34  ;;  %v1296_v34 = vpop.permute.xlu1 %1295 }
 0x23e   : > { %v2241_v57 = vmul.f32 0.2, %v2778_v41  ;;  %v2780_v59 = vadd.f32 %v2001_v56, %v1281_v45  ;;  %v2275_v62 = vsel %vm2203_vm2, %v2159_v35, %v2239_v47  ;;  %vm2205_vm7 = vcmp.gt.f32.partialorder %v2778_v41, 0.0  ;;  %2361 = vmatprep.subr.bf16.mxu1 %v2301_v33  ;;  %v1301_v33 = vpop.permute.xlu0 %1300 }
 0x23f   : > { %v2163_v63 = vpop.f32.mrb[36].mxu1  ;;  %vm2207_vm8 = vcmp.gt.f32.partialorder %v2779_v54, 0.0  ;;  %v2243_v0 = vmul.f32 0.2, %v2779_v54  ;;  %v3408_v1 = vpack.c.bf16 %v2275_v62, %v2272_v60  ;;  %2362 = vmatpush1.bf16.msra.mxu1 %v2300_v29  ;;  %v2276_v6 = vsel %vm2204_vm6, %v2777_v30, %v2240_v51 }
 0x240   : > { %v2164_v2 = vadd.f32 %v2163_v63, %v2083_v48  ;;  %v2165_v3 = vpop.f32.mrb[37].mxu1  ;;  %vm2208_vm9 = vcmp.gt.f32.partialorder %v2780_v59, 0.0  ;;  %v2244_v5 = vmul.f32 0.2, %v2780_v59  ;;  %v2277_v13 = vsel %vm2205_vm7, %v2778_v41, %v2241_v57 }
 0x241   : > { %v2166_v7 = vpop.f32.mrb[38].mxu1  ;;  %v2279_v8 = vsel %vm2207_vm8, %v2779_v54, %v2243_v0  ;;  %v2094_v25 = vadd.f32 %v3384_v55, %v1291_v14  ;;  %v2102_v63 = vadd.f32 %v3388_v61, %v1301_v33  ;;  %vm2350_vm8 = vcmask 785408  }
 0x242   : > { %v2005_v9 = vpop.f32.mrb[16].mxu0  ;;  %vm2206_vm10 = vcmp.gt.f32.partialorder %v2164_v2, 0.0  ;;  %v2167_v10 = vadd.f32 %v2166_v7, %v2086_v4  ;;  %v2303_v36 = vpack.c.bf16 %v2279_v8, %v2276_v6  ;;  %v2168_v11 = vpop.f32.mrb[39].mxu1  ;;  %v2242_v15 = vmul.f32 0.2, %v2164_v2 }
 0x243   : > { %v2007_v12 = vpop.f32.mrb[17].mxu0  ;;  %v2781_v16 = vadd.f32 %v2005_v9, %v1286_v46  ;;  %v2280_v18 = vsel %vm2208_vm9, %v2780_v59, %v2244_v5  ;;  %v2099_v59 = vadd.f32 %v3386_v58, %v1296_v34 }
 0x244   : > { %v2782_v17 = vadd.f32 %v2007_v12, %v1286_v46  ;;  %v2009_v49 = vpop.f32.mrb[18].mxu0  ;;  %vm2209_vm11 = vcmp.gt.f32.partialorder %v2167_v10, 0.0  ;;  %v2245_v19 = vmul.f32 0.2, %v2167_v10  ;;  %v2304_v22 = vpack.c.bf16 %v2280_v18, %v2277_v13 }
 0x245   : > { %v2783_v20 = vadd.f32 %v2009_v49, %v1291_v14  ;;  %v2011_v21 = vpop.f32.mrb[19].mxu0  ;;  %vm2210_vm12 = vcmp.gt.f32.partialorder %v2781_v16, 0.0  ;;  %v2246_v24 = vmul.f32 0.2, %v2781_v16  ;;  %v2278_v29 = vsel %vm2206_vm10, %v2164_v2, %v2242_v15 }
 0x246   : > { %v2784_v27 = vadd.f32 %v2011_v21, %v1291_v14  ;;  %2363 = vmatprep.subr.bf16.mxu1 %v2304_v22  ;;  %v2247_v43 = vmul.f32 0.2, %v2782_v17  ;;  %v2281_v31 = vsel %vm2209_vm11, %v2167_v10, %v2245_v19  ;;  %vm2211_vm15 = vcmp.gt.f32.partialorder %v2782_v17, 0.0 }
 0x247   : > { %vm2213_vm13 = vcmp.gt.f32.partialorder %v2783_v20, 0.0  ;;  %v2249_v26 = vmul.f32 0.2, %v2783_v20  ;;  %v2171_v40 = vpop.f32.mrb[40].mxu1  ;;  %v2282_v28 = vsel %vm2210_vm12, %v2781_v16, %v2246_v24  ;;  %2364 = vmatpush1.bf16.msra.mxu1 %v2303_v36  ;;  %v3418_v42 = vpack.c.bf16 %v2281_v31, %v2278_v29  ;;  %v2937_v24 = vld [vmem:[%s3468_s3 + $0x8] sm:$0xff]  }
 0x248   : > { %v2172_v35 = vadd.f32 %v2171_v40, %v2091_v23  ;;  %v2173_v37 = vpop.f32.mrb[41].mxu1  ;;  %vm2214_vm14 = vcmp.gt.f32.partialorder %v2784_v27, 0.0  ;;  %v2250_v30 = vmul.f32 0.2, %v2784_v27  ;;  %v2283_v60 = vsel %vm2211_vm15, %v2782_v17, %v2247_v43 }
 0x249   : > { %v2285_v52 = vsel %vm2213_vm13, %v2783_v20, %v2249_v26  ;;  %v2174_v55 = vpop.f32.mrb[42].mxu1  ;;  %v2936_v20 = vld [vmem:[%s3468_s3] sm:$0xff]   ;;  %v2328_v26 = vpop.permute.xlu0 %2327 }
 0x24a   : > { %v2306_v38 = vpack.c.bf16 %v2285_v52, %v2282_v28  ;;  %v2015_v41 = vpop.f32.mrb[20].mxu0  ;;  %v2248_v44 = vmul.f32 0.2, %v2172_v35  ;;  %v2175_v45 = vadd.f32 %v2174_v55, %v2094_v25  ;;  %v2176_v47 = vpop.f32.mrb[43].mxu1  ;;  %vm2212_vm1 = vcmp.gt.f32.partialorder %v2172_v35, 0.0 }
 0x24b   : > { %v2785_v48 = vadd.f32 %v2015_v41, %v1296_v34  ;;  %v2017_v50 = vpop.f32.mrb[21].mxu0  ;;  %v2286_v56 = vsel %vm2214_vm14, %v2784_v27, %v2250_v30 }
 0x24c   : > { %v2786_v51 = vadd.f32 %v2017_v50, %v1296_v34  ;;  %v2019_v54 = vpop.f32.mrb[22].mxu0  ;;  %vm2215_vm3 = vcmp.gt.f32.partialorder %v2175_v45, 0.0  ;;  %v2251_v57 = vmul.f32 0.2, %v2175_v45  ;;  %v2307_v2 = vpack.c.bf16 %v2286_v56, %v2283_v60 }
 0x24d   : > { %v2252_v62 = vmul.f32 0.2, %v2785_v48  ;;  %v2787_v0 = vadd.f32 %v2019_v54, %v1301_v33  ;;  %v2021_v46 = vpop.f32.mrb[23].mxu0  ;;  %vm2216_vm4 = vcmp.gt.f32.partialorder %v2785_v48, 0.0  ;;  %v2284_v4 = vsel %vm2212_vm1, %v2172_v35, %v2248_v44 }
 0x24e   : > { %v2788_v3 = vadd.f32 %v2021_v46, %v1301_v33  ;;  %v2287_v5 = vsel %vm2215_vm3, %v2175_v45, %v2251_v57  ;;  %v2253_v7 = vmul.f32 0.2, %v2786_v51  ;;  %2365 = vmatprep.subr.bf16.mxu1 %v2307_v2  ;;  %vm2217_vm0 = vcmp.gt.f32.partialorder %v2786_v51, 0.0  ;;  %v2338_v45 = vpop.permute.xlu0 %2337 }
 0x24f   : > { %v2179_v6 = vpop.f32.mrb[44].mxu1  ;;  %vm2219_vm5 = vcmp.gt.f32.partialorder %v2787_v0, 0.0  ;;  %v2255_v8 = vmul.f32 0.2, %v2787_v0  ;;  %v2308_v9 = vpack.c.bf16 %v2287_v5, %v2284_v4  ;;  %2366 = vmatpush1.bf16.msra.mxu1 %v2306_v38  ;;  %v2288_v61 = vsel %vm2216_vm4, %v2785_v48, %v2252_v62 }
 0x250   : > { %v2180_v58 = vadd.f32 %v2179_v6, %v2099_v59  ;;  %v2181_v10 = vpop.f32.mrb[45].mxu1  ;;  %vm2220_vm2 = vcmp.gt.f32.partialorder %v2788_v3, 0.0  ;;  %v2256_v36 = vmul.f32 0.2, %v2788_v3  ;;  %v2289_v17 = vsel %vm2217_vm0, %v2786_v51, %v2253_v7 }
 0x251   : > { %v2182_v11 = vpop.f32.mrb[46].mxu1  ;;  %v2291_v12 = vsel %vm2219_vm5, %v2787_v0, %v2255_v8 }
 0x252   : > { %v2254_v13 = vmul.f32 0.2, %v2180_v58  ;;  %v2183_v14 = vadd.f32 %v2182_v11, %v2102_v63  ;;  %v2309_v15 = vpack.c.bf16 %v2291_v12, %v2288_v61  ;;  %v2184_v16 = vpop.f32.mrb[47].mxu1  ;;  %vm2218_vm6 = vcmp.gt.f32.partialorder %v2180_v58, 0.0 }
 0x253   : > { %v2292_v49 = vsel %vm2220_vm2, %v2788_v3, %v2256_v36 }
 0x254   : > { %vm2221_vm7 = vcmp.gt.f32.partialorder %v2183_v14, 0.0  ;;  %v2257_v18 = vmul.f32 0.2, %v2183_v14  ;;  %v2310_v19 = vpack.c.bf16 %v2292_v49, %v2289_v17  ;;  %v2290_v21 = vsel %vm2218_vm6, %v2180_v58, %v2254_v13 }
 0x256   : > { %2367 = vmatprep.subr.bf16.mxu1 %v2310_v19  ;;  %v2293_v22 = vsel %vm2221_vm7, %v2183_v14, %v2257_v18 }
 0x257   : > { %2368 = vmatpush1.bf16.msra.mxu1 %v2309_v15  ;;  %v2311_v23 = vpack.c.bf16 %v2293_v22, %v2290_v21 }
 0x258   : > { %2749 = vmatprep.subr.bf16.mxu1 %v3393_v53 }
 0x25a   : > { %2683 = vmatmul.mubr.msk.bf16.vlgmr.msra.gmra.mrb[48].mxu1 %vm2350_vm8, %v2936_v20 }
 0x25b   : > { %2750 = vmatpush3.bf16.msra.mxu1 %v3393_v53  ;;  %2399 = vmatprep.mubr.bf16.mxu1 %v2979_v39  ;;  %v2323_v39 = vpop.permute.xlu1 %2322 }
 0x25c   : > { %2751 = vmatprep.subr.bf16.mxu1 %v3403_v32 }
 0x25f   : > { %2752 = vmatpush3.bf16.msra.mxu1 %v3403_v32  ;;  %v2333_v55 = vpop.permute.xlu1 %2332 }
 0x260   : > { %2753 = vmatprep.subr.bf16.mxu1 %v3408_v1 }
 0x262   : > { %2684 = vmatmul.mubr.msk.bf16.gmra.mrb[52].mxu1 %vm2350_vm8, %v2937_v24 }
 0x263   : > { %2754 = vmatpush3.bf16.msra.mxu1 %v3408_v1  ;;  %2761 = vmatprep.mubr.msk.bf16.mxu1 %vm2350_vm8, %v2936_v20 }
 0x264   : > { %2755 = vmatprep.subr.bf16.mxu1 %v3418_v42 }
 0x267   : > { %2756 = vmatpush3.bf16.msra.mxu1 %v3418_v42 }
 0x268   : > { %2757 = vmatprep.subr.bf16.mxu1 %v2308_v9 }
 0x26b   : > { %2758 = vmatpush3.bf16.msra.mxu1 %v2308_v9 }
 0x26c   : > { %2759 = vmatprep.subr.bf16.mxu1 %v2311_v23 }
 0x26f   : > { %2760 = vmatpush3.bf16.msra.mxu1 %v2311_v23 }
 0x272   : > { %2762 = vmatmul.mubr.msk.bf16.vlgmr.msra.gmra.mrb[56].mxu1 %vm2350_vm8, %v2937_v24 }
 0x32d   : > { %v2391_v53 = vpop.f32.mrb[48].mxu1 }
 0x32e   : > { %v2392_v32 = vadd.f32 %v2391_v53, %v2323_v39  ;;  %v2393_v25 = vpop.f32.mrb[49].mxu1 }
 0x32f   : > { %v2394_v27 = vadd.f32 %v2393_v25, %v2323_v39  ;;  %v2395_v1 = vpop.f32.mrb[50].mxu1 }
 0x330   : > { %vm2459_vm9 = vcmp.gt.f32.partialorder %v2392_v32, 0.0  ;;  %v2471_v40 = vmul.f32 0.2, %v2392_v32  ;;  %v2396_v28 = vadd.f32 %v2395_v1, %v2328_v26  ;;  %v2397_v43 = vpop.f32.mrb[51].mxu1 }
 0x331   : > { %vm2460_vm10 = vcmp.gt.f32.partialorder %v2394_v27, 0.0  ;;  %v2472_v29 = vmul.f32 0.2, %v2394_v27  ;;  %v2398_v31 = vadd.f32 %v2397_v43, %v2328_v26 }
 0x332   : > { %v2483_v34 = vsel %vm2459_vm9, %v2392_v32, %v2471_v40  ;;  %vm2462_vm11 = vcmp.gt.f32.partialorder %v2396_v28, 0.0  ;;  %v2474_v35 = vmul.f32 0.2, %v2396_v28 }
 0x333   : > { %2495 = vst [vmem:[%s3448_s22] sm:$0xff] %v2483_v34  ;;  %v2484_v37 = vsel %vm2460_vm10, %v2394_v27, %v2472_v29  ;;  %vm2463_vm12 = vcmp.gt.f32.partialorder %v2398_v31, 0.0  ;;  %v2475_v52 = vmul.f32 0.2, %v2398_v31 }
 0x334   : > { %2496 = vst [vmem:[%s3448_s22 + $0x8] sm:$0xff] %v2484_v37  ;;  %v2486_v30 = vsel %vm2462_vm11, %v2396_v28, %v2474_v35 }
 0x335   : > { %2498 = vst [vmem:[%s3448_s22 + $0x18] sm:$0xff] %v2486_v30  ;;  %v2487_v38 = vsel %vm2463_vm12, %v2398_v31, %v2475_v52  ;;  %v2401_v41 = vpop.f32.mrb[52].mxu1 }
 0x336   : > { %2499 = vst [vmem:[%s3448_s22 + $0x20] sm:$0xff] %v2487_v38  ;;  %v2402_v42 = vadd.f32 %v2401_v41, %v2333_v55  ;;  %v2403_v44 = vpop.f32.mrb[53].mxu1 }
 0x337   : > { %v2404_v47 = vadd.f32 %v2403_v44, %v2333_v55  ;;  %v2405_v48 = vpop.f32.mrb[54].mxu1 }
 0x338   : > { %vm2465_vm13 = vcmp.gt.f32.partialorder %v2402_v42, 0.0  ;;  %v2477_v50 = vmul.f32 0.2, %v2402_v42  ;;  %v2406_v51 = vadd.f32 %v2405_v48, %v2338_v45  ;;  %v2407_v54 = vpop.f32.mrb[55].mxu1 }
 0x339   : > { %vm2466_vm14 = vcmp.gt.f32.partialorder %v2404_v47, 0.0  ;;  %v2478_v56 = vmul.f32 0.2, %v2404_v47  ;;  %v2408_v33 = vadd.f32 %v2407_v54, %v2338_v45 }
 0x33a   : > { %v2489_v57 = vsel %vm2465_vm13, %v2402_v42, %v2477_v50  ;;  %vm2468_vm15 = vcmp.gt.f32.partialorder %v2406_v51, 0.0  ;;  %v2480_v59 = vmul.f32 0.2, %v2406_v51 }
 0x33b   : > { %2501 = vst [vmem:[%s3448_s22 + $0x30] sm:$0xff] %v2489_v57  ;;  %v2490_v60 = vsel %vm2466_vm14, %v2404_v47, %v2478_v56  ;;  %vm2469_vm1 = vcmp.gt.f32.partialorder %v2408_v33, 0.0  ;;  %v2481_v62 = vmul.f32 0.2, %v2408_v33 }
 0x33c   : > { %2502 = vst [vmem:[%s3448_s22 + $0x38] sm:$0xff] %v2490_v60  ;;  %v2492_v63 = vsel %vm2468_vm15, %v2406_v51, %v2480_v59 }
 0x33d   : > { %2504 = vst [vmem:[%s3448_s22 + $0x48] sm:$0xff] %v2492_v63  ;;  %v2493_v0 = vsel %vm2469_vm1, %v2408_v33, %v2481_v62 }
 0x33e   : > { %2505 = vst [vmem:[%s3448_s22 + $0x50] sm:$0xff] %v2493_v0 }
 0x345   : > { %v2763_v46 = vpop.f32.mrb[56].mxu1 }
 0x346   : > { %v2453_v2 = vadd.f32 %v2763_v46, %v2333_v55  ;;  %v2444_v3 = vpop.f32.mrb[57].mxu1 }
 0x347   : > { %v2445_v4 = vadd.f32 %v2444_v3, %v2323_v39  ;;  %v2764_v5 = vpop.f32.mrb[58].mxu1 }
 0x348   : > { %vm2467_vm3 = vcmp.gt.f32.partialorder %v2453_v2, 0.0  ;;  %v2479_v6 = vmul.f32 0.2, %v2453_v2  ;;  %v2456_v7 = vadd.f32 %v2764_v5, %v2338_v45  ;;  %v2447_v8 = vpop.f32.mrb[59].mxu1 }
 0x349   : > { %vm2461_vm4 = vcmp.gt.f32.partialorder %v2445_v4, 0.0  ;;  %v2473_v9 = vmul.f32 0.2, %v2445_v4  ;;  %v2448_v58 = vadd.f32 %v2447_v8, %v2328_v26 }
 0x34a   : > { %v2491_v10 = vsel %vm2467_vm3, %v2453_v2, %v2479_v6  ;;  %vm2470_vm5 = vcmp.gt.f32.partialorder %v2456_v7, 0.0  ;;  %v2482_v36 = vmul.f32 0.2, %v2456_v7 }
 0x34b   : > { %2503 = vst [vmem:[%s3448_s22 + $0x40] sm:$0xff] %v2491_v10  ;;  %v2485_v61 = vsel %vm2461_vm4, %v2445_v4, %v2473_v9  ;;  %vm2464_vm0 = vcmp.gt.f32.partialorder %v2448_v58, 0.0  ;;  %v2476_v11 = vmul.f32 0.2, %v2448_v58 }
 0x34c   : > { %2497 = vst [vmem:[%s3448_s22 + $0x10] sm:$0xff] %v2485_v61  ;;  %v2494_v12 = vsel %vm2470_vm5, %v2456_v7, %v2482_v36 }
 0x34d   : > { %2506 = vst [vmem:[%s3448_s22 + $0x58] sm:$0xff] %v2494_v12  ;;  %v2488_v13 = vsel %vm2464_vm0, %v2448_v58, %v2476_v11 }
 0x34e   : > { %2500 = vst [vmem:[%s3448_s22 + $0x28] sm:$0xff] %v2488_v13 }
 0x34f PF: > { %s15_s18 = sadd.s32 1, %s2944_s18  }
 0x350   : > { %p12_p4 = scmp.ge.s32.totalorder %s15_s18, 4  }
 0x352   :  { %14 = sbr.rel (!%p12_p4) target bundleno = 1 (0x1), region = 70 }

</bundles_post_ra>
